<compile_context>
chip_gen: v7x
topology: tpu7x:2x2x1
jax: 0.10.0
libtpu: 0.0.40
codegen_flags: <defaults>
</compile_context>

<pallas_src>
import functools

import jax
import jax.numpy as jnp
from jax.experimental import pallas as pl
from jax.experimental.pallas import tpu as pltpu


# ----------------------------- Pallas kernel ------------------------------


def _bipartite_gcn_kernel(a_ref, at_ref, x_ref,
                          w0, w1, w2, w3, w4, w5,
                          fcw_ref, b_ref, o_ref):
    """Fused 6-layer bipartite GCN + final fc.  All dims padded to multiples of 128.

      a_ref    bf16 [n_i_pad, n_r_pad]   normalized adjacency  (read -> intron)
      at_ref   bf16 [n_r_pad, n_i_pad]   its transpose          (intron -> read)
      x_ref    bf16 [n_r_pad, 128]       read features (feature dim padded)
      w0..w5   bf16 [128, 128]           gate-folded GraphConv weights (padded)
      fcw_ref  bf16 [128, 128]           fc weight, rows=out_ch pad, cols=2 pad
      b_ref    f32  [8, 128]             rows 0..5: layer biases (gate-folded),
                                         row 6: fc bias, row 7: unused
      o_ref    f32  [n_r_pad, 128]       lane-dense output; real data in [:, :2]
    """
    w_refs = (w0, w1, w2, w3, w4, w5)
    b_all = b_ref[...]                      # f32 [8, 128]
    h = x_ref[...]                          # bf16 [n_r_pad, 128]

    # Statically unrolled layer stack (trace-time Python loop).
    for i in range(6):
        adj_ref = a_ref if (i % 2 == 0) else at_ref     # dst x src, no in-kernel transpose
        n_dst, n_src = adj_ref.shape
        w = w_refs[i][...]                               # bf16 [128, 128]
        f_in, f_out = w.shape
        b = b_all[i:i + 1, :]                            # f32 [1, 128]

        # Pick association by total MACs (static shapes -> trace-time decision).
        cost_agg_first = n_dst * n_src * f_in + n_dst * f_in * f_out
        cost_xfm_first = n_src * f_in * f_out + n_dst * n_src * f_out
        if cost_agg_first <= cost_xfm_first:
            # (A @ X) @ W
            agg = jnp.dot(adj_ref[...], h, preferred_element_type=jnp.float32)
            z = jnp.dot(agg.astype(jnp.bfloat16), w,
                        preferred_element_type=jnp.float32)
        else:
            # A @ (X @ W)
            xw = jnp.dot(h, w, preferred_element_type=jnp.float32)
            z = jnp.dot(adj_ref[...], xw.astype(jnp.bfloat16),
                        preferred_element_type=jnp.float32)

        h = jnp.maximum(z + b, 0.0).astype(jnp.bfloat16)

    # Final fc on the read nodes (layer 5 is intron -> read).  Lane-dense store.
    o_ref[...] = (
        jnp.dot(h, fcw_ref[...], preferred_element_type=jnp.float32) + b_all[6:7, :]
    )


# ----------------------------- Model (glue) --------------------------------


def _round_up(n, m):
    return ((n + m - 1) // m) * m


def _pad2d(x, rows, cols):
    return jnp.pad(x, ((0, rows - x.shape[0]), (0, cols - x.shape[1])))


def normalize_adjacency(a):
    """DGL GraphConv norm='both' folded into the adjacency.

    a: [n_dst, n_src] 0/1 dense adjacency.
    Returns Dhat_dst^{-1/2} A Dhat_src^{-1/2}, degrees clamped to >= 1.
    """
    in_deg = jnp.clip(jnp.sum(a, axis=1), 1.0, None)    # dst in-degrees
    out_deg = jnp.clip(jnp.sum(a, axis=0), 1.0, None)   # src out-degrees
    return a * jax.lax.rsqrt(in_deg)[:, None] * jax.lax.rsqrt(out_deg)[None, :]


def init_params(key, in_channels, out_channels):
    dims = [in_channels, 64, 128, 128, 128, 128, out_channels]
    params = {"conv_w": [], "conv_b": [], "att": []}
    for i in range(6):
        key, kw, ka = jax.random.split(key, 3)
        fan_in, fan_out = dims[i], dims[i + 1]
        # Glorot-uniform like DGL GraphConv weight init (deterministic via PRNGKey).
        limit = (6.0 / (fan_in + fan_out)) ** 0.5
        params["conv_w"].append(
            jax.random.uniform(kw, (fan_in, fan_out), jnp.float32, -limit, limit)
        )
        params["conv_b"].append(jnp.zeros((fan_out,), jnp.float32))
        params["att"].append(jax.random.normal(ka, (1,), jnp.float32))
    key, kfw, kfb = jax.random.split(key, 3)
    limit = 1.0 / (out_channels ** 0.5)
    # stored as [out_channels, 2] so the kernel computes x @ W directly
    params["fc_w"] = jax.random.uniform(
        kfw, (out_channels, 2), jnp.float32, -limit, limit
    )
    params["fc_b"] = jax.random.uniform(kfb, (2,), jnp.float32, -limit, limit)
    return params


def _vmem_limit_bytes(n_r_pad, n_i_pad, feat_pad):
    """Scoped-VMEM request sized from actual residency (+ headroom)."""
    adj = 2 * n_i_pad * n_r_pad * 2                         # A and A^T, bf16
    acts = max(n_r_pad, n_i_pad) * feat_pad * (2 + 4 + 4)   # bf16 h + f32 temps
    weights = 7 * feat_pad * feat_pad * 2 + 8 * feat_pad * 4
    io = n_r_pad * feat_pad * (2 + 4)                       # x (bf16) + out (f32)
    total = adj + acts + weights + io
    total = int(total * 2.0) + (4 << 20)                    # double-buffer / align headroom
    return int(min(max(total, 8 << 20), 100 << 20))


@functools.partial(jax.jit, static_argnames=())
def bipartite_gcn_forward(params, h_read, a_read_to_intron):
    """Forward pass of BipartiteGCN (single fused Pallas kernel).

    h_read:            [n_read, in_channels]
    a_read_to_intron:  [n_intron, n_read]  dense 0/1 adjacency (dst=intron, src=read)
    returns:           [n_read, 2]
    """
    n_read, in_channels = h_read.shape
    n_intron = a_read_to_intron.shape[0]
    out_channels = params["fc_w"].shape[0]

    feat_pad = 128
    n_r_pad = _round_up(n_read, 128)
    n_i_pad = _round_up(n_intron, 128)

    # Normalize in f32 BEFORE padding (padded zero rows/cols contribute nothing).
    a_norm = normalize_adjacency(a_read_to_intron)
    a_pad = _pad2d(a_norm, n_i_pad, n_r_pad).astype(jnp.bfloat16)
    at_pad = _pad2d(a_norm.T, n_r_pad, n_i_pad).astype(jnp.bfloat16)

    x_pad = _pad2d(h_read, n_r_pad, feat_pad).astype(jnp.bfloat16)

    # Fold the (positive) sigmoid attention gates into W and b; pad to 128x128 tiles.
    ws = []
    b_pack = jnp.zeros((8, feat_pad), jnp.float32)
    for i in range(6):
        gate = jax.nn.sigmoid(params["att"][i])             # (1,), positive
        w_g = params["conv_w"][i] * gate
        ws.append(_pad2d(w_g, feat_pad, feat_pad).astype(jnp.bfloat16))
        b_g = params["conv_b"][i] * gate
        b_pack = b_pack.at[i, : b_g.shape[0]].set(b_g)
    b_pack = b_pack.at[6, :2].set(params["fc_b"])

    fc_w = _pad2d(params["fc_w"], feat_pad, feat_pad).astype(jnp.bfloat16)

    vmem = pl.BlockSpec(memory_space=pltpu.MemorySpace.VMEM)
    n_inputs = 3 + 6 + 1 + 1

    out_pad = pl.pallas_call(
        _bipartite_gcn_kernel,
        out_shape=jax.ShapeDtypeStruct((n_r_pad, feat_pad), jnp.float32),
        in_specs=[vmem] * n_inputs,
        out_specs=vmem,
        compiler_params=pltpu.CompilerParams(
            vmem_limit_bytes=_vmem_limit_bytes(n_r_pad, n_i_pad, feat_pad)
        ),
    )(a_pad, at_pad, x_pad, *ws, fc_w, b_pack)

    return out_pad[:n_read, :2]


# --------------------------------- main -------------------------------------

if __name__ == "__main__":
    in_channels = 16
    out_channels = 32
    n_read = 16
    n_intron = 12

    key = jax.random.PRNGKey(0)
    key, k_feat, k_params = jax.random.split(key, 3)

    # Deterministic read node features.
    h_read = jax.random.normal(k_feat, (n_read, in_channels), jnp.float32)

    # Deterministic bipartite edge set: read r -> introns (r mod n_intron) and
    # ((r + 3) mod n_intron). Dense adjacency [n_intron, n_read].
    reads = jnp.arange(n_read)
    a = jnp.zeros((n_intron, n_read), jnp.float32)
    a = a.at[reads % n_intron, reads].set(1.0)
    a = a.at[(reads + 3) % n_intron, reads].set(1.0)

    params = init_params(k_params, in_channels, out_channels)

    out = bipartite_gcn_forward(params, h_read, a)
    out = jax.block_until_ready(out)

    assert out.shape == (n_read, 2) and out.dtype == jnp.float32
    assert bool(jnp.all(jnp.isfinite(out)))
    print("KERNEL_OK")
</pallas_src>

<mosaic_0001>
module attributes {stable_mosaic.version = 11 : i64} {
  func.func @_bipartite_gcn_kernel(%arg0: memref<128x128xbf16, #tpu.memory_space<vmem>>, %arg1: memref<128x128xbf16, #tpu.memory_space<vmem>>, %arg2: memref<128x128xbf16, #tpu.memory_space<vmem>>, %arg3: memref<128x128xbf16, #tpu.memory_space<vmem>>, %arg4: memref<128x128xbf16, #tpu.memory_space<vmem>>, %arg5: memref<128x128xbf16, #tpu.memory_space<vmem>>, %arg6: memref<128x128xbf16, #tpu.memory_space<vmem>>, %arg7: memref<128x128xbf16, #tpu.memory_space<vmem>>, %arg8: memref<128x128xbf16, #tpu.memory_space<vmem>>, %arg9: memref<128x128xbf16, #tpu.memory_space<vmem>>, %arg10: memref<8x128xf32, #tpu.memory_space<vmem>>, %arg11: memref<128x128xf32, #tpu.memory_space<vmem>>) attributes {dimension_semantics = [], scalar_prefetch = 0 : i64, scratch_operands = 0 : i64, tpu.core_type = #tpu.core_type<tc>} {
    %c0 = arith.constant 0 : index
    %c0_0 = arith.constant 0 : index
    %0 = vector.load %arg10[%c0, %c0_0] : memref<8x128xf32, #tpu.memory_space<vmem>>, vector<8x128xf32>
    %c0_1 = arith.constant 0 : index
    %c0_2 = arith.constant 0 : index
    %1 = vector.load %arg2[%c0_1, %c0_2] : memref<128x128xbf16, #tpu.memory_space<vmem>>, vector<128x128xbf16>
    %c0_3 = arith.constant 0 : index
    %c0_4 = arith.constant 0 : index
    %2 = vector.load %arg3[%c0_3, %c0_4] : memref<128x128xbf16, #tpu.memory_space<vmem>>, vector<128x128xbf16>
    %3 = vector.extract_strided_slice %0 {offsets = [0, 0], sizes = [1, 128], strides = [1, 1]} : vector<8x128xf32> to vector<1x128xf32>
    %c0_5 = arith.constant 0 : index
    %c0_6 = arith.constant 0 : index
    %4 = vector.load %arg0[%c0_5, %c0_6] : memref<128x128xbf16, #tpu.memory_space<vmem>>, vector<128x128xbf16>
    %cst = arith.constant dense<0.000000e+00> : vector<128x128xf32>
    %5 = tpu.matmul %4, %1, %cst {dimension_numbers = #tpu.dot_dimension_numbers<[1], [0], [0], [1], [0, 0, 1, 1], [], []>} : vector<128x128xbf16>, vector<128x128xbf16>, vector<128x128xf32> -> vector<128x128xf32>
    %6 = arith.truncf %5 : vector<128x128xf32> to vector<128x128xbf16>
    %cst_7 = arith.constant dense<0.000000e+00> : vector<128x128xf32>
    %7 = tpu.matmul %6, %2, %cst_7 {dimension_numbers = #tpu.dot_dimension_numbers<[1], [0], [0], [1], [0, 0, 1, 1], [], []>} : vector<128x128xbf16>, vector<128x128xbf16>, vector<128x128xf32> -> vector<128x128xf32>
    %8 = vector.broadcast %3 : vector<1x128xf32> to vector<128x128xf32>
    %9 = arith.addf %7, %8 : vector<128x128xf32>
    %cst_8 = arith.constant 0.000000e+00 : f32
    %10 = vector.broadcast %cst_8 : f32 to vector<128x128xf32>
    %11 = arith.maximumf %9, %10 : vector<128x128xf32>
    %12 = arith.truncf %11 : vector<128x128xf32> to vector<128x128xbf16>
    %c0_9 = arith.constant 0 : index
    %c0_10 = arith.constant 0 : index
    %13 = vector.load %arg4[%c0_9, %c0_10] : memref<128x128xbf16, #tpu.memory_space<vmem>>, vector<128x128xbf16>
    %14 = vector.extract_strided_slice %0 {offsets = [1, 0], sizes = [1, 128], strides = [1, 1]} : vector<8x128xf32> to vector<1x128xf32>
    %c0_11 = arith.constant 0 : index
    %c0_12 = arith.constant 0 : index
    %15 = vector.load %arg1[%c0_11, %c0_12] : memref<128x128xbf16, #tpu.memory_space<vmem>>, vector<128x128xbf16>
    %cst_13 = arith.constant dense<0.000000e+00> : vector<128x128xf32>
    %16 = tpu.matmul %15, %12, %cst_13 {dimension_numbers = #tpu.dot_dimension_numbers<[1], [0], [0], [1], [0, 0, 1, 1], [], []>} : vector<128x128xbf16>, vector<128x128xbf16>, vector<128x128xf32> -> vector<128x128xf32>
    %17 = arith.truncf %16 : vector<128x128xf32> to vector<128x128xbf16>
    %cst_14 = arith.constant dense<0.000000e+00> : vector<128x128xf32>
    %18 = tpu.matmul %17, %13, %cst_14 {dimension_numbers = #tpu.dot_dimension_numbers<[1], [0], [0], [1], [0, 0, 1, 1], [], []>} : vector<128x128xbf16>, vector<128x128xbf16>, vector<128x128xf32> -> vector<128x128xf32>
    %19 = vector.broadcast %14 : vector<1x128xf32> to vector<128x128xf32>
    %20 = arith.addf %18, %19 : vector<128x128xf32>
    %cst_15 = arith.constant 0.000000e+00 : f32
    %21 = vector.broadcast %cst_15 : f32 to vector<128x128xf32>
    %22 = arith.maximumf %20, %21 : vector<128x128xf32>
    %23 = arith.truncf %22 : vector<128x128xf32> to vector<128x128xbf16>
    %c0_16 = arith.constant 0 : index
    %c0_17 = arith.constant 0 : index
    %24 = vector.load %arg5[%c0_16, %c0_17] : memref<128x128xbf16, #tpu.memory_space<vmem>>, vector<128x128xbf16>
    %25 = vector.extract_strided_slice %0 {offsets = [2, 0], sizes = [1, 128], strides = [1, 1]} : vector<8x128xf32> to vector<1x128xf32>
    %c0_18 = arith.constant 0 : index
    %c0_19 = arith.constant 0 : index
    %26 = vector.load %arg0[%c0_18, %c0_19] : memref<128x128xbf16, #tpu.memory_space<vmem>>, vector<128x128xbf16>
    %cst_20 = arith.constant dense<0.000000e+00> : vector<128x128xf32>
    %27 = tpu.matmul %26, %23, %cst_20 {dimension_numbers = #tpu.dot_dimension_numbers<[1], [0], [0], [1], [0, 0, 1, 1], [], []>} : vector<128x128xbf16>, vector<128x128xbf16>, vector<128x128xf32> -> vector<128x128xf32>
    %28 = arith.truncf %27 : vector<128x128xf32> to vector<128x128xbf16>
    %cst_21 = arith.constant dense<0.000000e+00> : vector<128x128xf32>
    %29 = tpu.matmul %28, %24, %cst_21 {dimension_numbers = #tpu.dot_dimension_numbers<[1], [0], [0], [1], [0, 0, 1, 1], [], []>} : vector<128x128xbf16>, vector<128x128xbf16>, vector<128x128xf32> -> vector<128x128xf32>
    %30 = vector.broadcast %25 : vector<1x128xf32> to vector<128x128xf32>
    %31 = arith.addf %29, %30 : vector<128x128xf32>
    %cst_22 = arith.constant 0.000000e+00 : f32
    %32 = vector.broadcast %cst_22 : f32 to vector<128x128xf32>
    %33 = arith.maximumf %31, %32 : vector<128x128xf32>
    %34 = arith.truncf %33 : vector<128x128xf32> to vector<128x128xbf16>
    %c0_23 = arith.constant 0 : index
    %c0_24 = arith.constant 0 : index
    %35 = vector.load %arg6[%c0_23, %c0_24] : memref<128x128xbf16, #tpu.memory_space<vmem>>, vector<128x128xbf16>
    %36 = vector.extract_strided_slice %0 {offsets = [3, 0], sizes = [1, 128], strides = [1, 1]} : vector<8x128xf32> to vector<1x128xf32>
    %c0_25 = arith.constant 0 : index
    %c0_26 = arith.constant 0 : index
    %37 = vector.load %arg1[%c0_25, %c0_26] : memref<128x128xbf16, #tpu.memory_space<vmem>>, vector<128x128xbf16>
    %cst_27 = arith.constant dense<0.000000e+00> : vector<128x128xf32>
    %38 = tpu.matmul %37, %34, %cst_27 {dimension_numbers = #tpu.dot_dimension_numbers<[1], [0], [0], [1], [0, 0, 1, 1], [], []>} : vector<128x128xbf16>, vector<128x128xbf16>, vector<128x128xf32> -> vector<128x128xf32>
    %39 = arith.truncf %38 : vector<128x128xf32> to vector<128x128xbf16>
    %cst_28 = arith.constant dense<0.000000e+00> : vector<128x128xf32>
    %40 = tpu.matmul %39, %35, %cst_28 {dimension_numbers = #tpu.dot_dimension_numbers<[1], [0], [0], [1], [0, 0, 1, 1], [], []>} : vector<128x128xbf16>, vector<128x128xbf16>, vector<128x128xf32> -> vector<128x128xf32>
    %41 = vector.broadcast %36 : vector<1x128xf32> to vector<128x128xf32>
    %42 = arith.addf %40, %41 : vector<128x128xf32>
    %cst_29 = arith.constant 0.000000e+00 : f32
    %43 = vector.broadcast %cst_29 : f32 to vector<128x128xf32>
    %44 = arith.maximumf %42, %43 : vector<128x128xf32>
    %45 = arith.truncf %44 : vector<128x128xf32> to vector<128x128xbf16>
    %c0_30 = arith.constant 0 : index
    %c0_31 = arith.constant 0 : index
    %46 = vector.load %arg7[%c0_30, %c0_31] : memref<128x128xbf16, #tpu.memory_space<vmem>>, vector<128x128xbf16>
    %47 = vector.extract_strided_slice %0 {offsets = [4, 0], sizes = [1, 128], strides = [1, 1]} : vector<8x128xf32> to vector<1x128xf32>
    %c0_32 = arith.constant 0 : index
    %c0_33 = arith.constant 0 : index
    %48 = vector.load %arg0[%c0_32, %c0_33] : memref<128x128xbf16, #tpu.memory_space<vmem>>, vector<128x128xbf16>
    %cst_34 = arith.constant dense<0.000000e+00> : vector<128x128xf32>
    %49 = tpu.matmul %48, %45, %cst_34 {dimension_numbers = #tpu.dot_dimension_numbers<[1], [0], [0], [1], [0, 0, 1, 1], [], []>} : vector<128x128xbf16>, vector<128x128xbf16>, vector<128x128xf32> -> vector<128x128xf32>
    %50 = arith.truncf %49 : vector<128x128xf32> to vector<128x128xbf16>
    %cst_35 = arith.constant dense<0.000000e+00> : vector<128x128xf32>
    %51 = tpu.matmul %50, %46, %cst_35 {dimension_numbers = #tpu.dot_dimension_numbers<[1], [0], [0], [1], [0, 0, 1, 1], [], []>} : vector<128x128xbf16>, vector<128x128xbf16>, vector<128x128xf32> -> vector<128x128xf32>
    %52 = vector.broadcast %47 : vector<1x128xf32> to vector<128x128xf32>
    %53 = arith.addf %51, %52 : vector<128x128xf32>
    %cst_36 = arith.constant 0.000000e+00 : f32
    %54 = vector.broadcast %cst_36 : f32 to vector<128x128xf32>
    %55 = arith.maximumf %53, %54 : vector<128x128xf32>
    %56 = arith.truncf %55 : vector<128x128xf32> to vector<128x128xbf16>
    %c0_37 = arith.constant 0 : index
    %c0_38 = arith.constant 0 : index
    %57 = vector.load %arg8[%c0_37, %c0_38] : memref<128x128xbf16, #tpu.memory_space<vmem>>, vector<128x128xbf16>
    %58 = vector.extract_strided_slice %0 {offsets = [5, 0], sizes = [1, 128], strides = [1, 1]} : vector<8x128xf32> to vector<1x128xf32>
    %c0_39 = arith.constant 0 : index
    %c0_40 = arith.constant 0 : index
    %59 = vector.load %arg1[%c0_39, %c0_40] : memref<128x128xbf16, #tpu.memory_space<vmem>>, vector<128x128xbf16>
    %cst_41 = arith.constant dense<0.000000e+00> : vector<128x128xf32>
    %60 = tpu.matmul %59, %56, %cst_41 {dimension_numbers = #tpu.dot_dimension_numbers<[1], [0], [0], [1], [0, 0, 1, 1], [], []>} : vector<128x128xbf16>, vector<128x128xbf16>, vector<128x128xf32> -> vector<128x128xf32>
    %61 = arith.truncf %60 : vector<128x128xf32> to vector<128x128xbf16>
    %cst_42 = arith.constant dense<0.000000e+00> : vector<128x128xf32>
    %62 = tpu.matmul %61, %57, %cst_42 {dimension_numbers = #tpu.dot_dimension_numbers<[1], [0], [0], [1], [0, 0, 1, 1], [], []>} : vector<128x128xbf16>, vector<128x128xbf16>, vector<128x128xf32> -> vector<128x128xf32>
    %63 = vector.broadcast %58 : vector<1x128xf32> to vector<128x128xf32>
    %64 = arith.addf %62, %63 : vector<128x128xf32>
    %cst_43 = arith.constant 0.000000e+00 : f32
    %65 = vector.broadcast %cst_43 : f32 to vector<128x128xf32>
    %66 = arith.maximumf %64, %65 : vector<128x128xf32>
    %67 = arith.truncf %66 : vector<128x128xf32> to vector<128x128xbf16>
    %c0_44 = arith.constant 0 : index
    %c0_45 = arith.constant 0 : index
    %68 = vector.load %arg9[%c0_44, %c0_45] : memref<128x128xbf16, #tpu.memory_space<vmem>>, vector<128x128xbf16>
    %cst_46 = arith.constant dense<0.000000e+00> : vector<128x128xf32>
    %69 = tpu.matmul %67, %68, %cst_46 {dimension_numbers = #tpu.dot_dimension_numbers<[1], [0], [0], [1], [0, 0, 1, 1], [], []>} : vector<128x128xbf16>, vector<128x128xbf16>, vector<128x128xf32> -> vector<128x128xf32>
    %70 = vector.extract_strided_slice %0 {offsets = [6, 0], sizes = [1, 128], strides = [1, 1]} : vector<8x128xf32> to vector<1x128xf32>
    %71 = vector.broadcast %70 : vector<1x128xf32> to vector<128x128xf32>
    %72 = arith.addf %69, %71 : vector<128x128xf32>
    %c0_47 = arith.constant 0 : index
    %c0_48 = arith.constant 0 : index
    %73 = vector.load %arg11[%c0_47, %c0_48] : memref<128x128xf32, #tpu.memory_space<vmem>>, vector<128x128xf32>
    tpu.vector_store %arg11[%c0_47, %c0_48], %72 {strides = array<i32>} : memref<128x128xf32, #tpu.memory_space<vmem>>, vector<128x128xf32>,
    return
  }
}

</mosaic_0001>

<bundles_post_ra>
// kernel: bipartite_gcn_forward.1
= control target key start
LH: loop header
LB: loop body
LE: loop exit
PB: predicated region body
PF: predicated region fallthrough
CT: control target
= control target key end

     0   :  { %v289_v56 = vlaneseq  ;;  %s3484_s2 = inlined_call_operand.vmem [shape: bf16[128,128], index: 2, kind: input, shape index: {}]   ;;  %s3485_s0 = inlined_call_operand.vmem [shape: bf16[128,128], index: 0, kind: input, shape index: {}]   ;;  %s3486_s3 = inlined_call_operand.vmem [shape: bf16[128,128], index: 3, kind: input, shape index: {}]   ;;  %s3487_s1 = inlined_call_operand.vmem [shape: bf16[128,128], index: 1, kind: input, shape index: {}]   ;;  %s3488_s4 = inlined_call_operand.vmem [shape: bf16[128,128], index: 4, kind: input, shape index: {}]   ;;  %s3489_s10 = inlined_call_operand.vmem [shape: f32[8,128], index: 10, kind: input, shape index: {}]   ;;  %s3490_s5 = inlined_call_operand.vmem [shape: bf16[128,128], index: 5, kind: input, shape index: {}]   ;;  %s3491_s6 = inlined_call_operand.vmem [shape: bf16[128,128], index: 6, kind: input, shape index: {}]   ;;  %s3492_s7 = inlined_call_operand.vmem [shape: bf16[128,128], index: 7, kind: input, shape index: {}]   ;;  %s3493_s8 = inlined_call_operand.vmem [shape: bf16[128,128], index: 8, kind: input, shape index: {}]   ;;  %s3494_s9 = inlined_call_operand.vmem [shape: bf16[128,128], index: 9, kind: input, shape index: {}]   ;;  %s3495_s11 = inlined_call_operand.vmem [shape: f32[128,128], index: 11, kind: output, shape index: {}]  }
   0x1   :  { %v2901_v0 = vld [vmem:[%s3484_s2] sm:$0xff]   ;;  %v2902_v1 = vld [vmem:[%s3484_s2 + $0x8] sm:$0xff]   ;;  %v2903_v2 = vld [vmem:[%s3484_s2 + $0x10] sm:$0xff]  }
   0x2   :  { %2469 = vmatprep.subr.bf16.mxu0 %v2901_v0  ;;  %v2904_v3 = vld [vmem:[%s3484_s2 + $0x18] sm:$0xff]   ;;  %v3073_v4 = vld [vmem:[%s3485_s0] sm:$0xff]   ;;  %v2906_v6 = vld [vmem:[%s3484_s2 + $0x28] sm:$0xff]   ;;  %v3181_v57 = vshrl.u32 %v289_v56, 7 }
   0x3   :  { %2470 = vmatpush3.bf16.msra.mxu0 %v2901_v0  ;;  %2485 = vmatprep.mubr.bf16.mxu0 %v3073_v4  ;;  %v2905_v5 = vld [vmem:[%s3484_s2 + $0x20] sm:$0xff]   ;;  %v2918_v8 = vld [vmem:[%s3486_s3 + $0x8] sm:$0xff]   ;;  %v2907_v9 = vld [vmem:[%s3484_s2 + $0x30] sm:$0xff]  }
   0x4   :  { %2471 = vmatprep.subr.bf16.mxu0 %v2902_v1  ;;  %v2917_v7 = vld [vmem:[%s3486_s3] sm:$0xff]   ;;  %v2919_v10 = vld [vmem:[%s3486_s3 + $0x10] sm:$0xff]   ;;  %v2908_v11 = vld [vmem:[%s3484_s2 + $0x38] sm:$0xff]   ;;  %v291_v58 = vsub.s32 0, %v3181_v57 }
   0x5   :  { %2501 = vmatprep.subr.bf16.mxu1 %v2917_v7  ;;  %v2920_v12 = vld [vmem:[%s3486_s3 + $0x18] sm:$0xff]   ;;  %v2921_v13 = vld [vmem:[%s3486_s3 + $0x20] sm:$0xff]   ;;  %v3106_v14 = vld [vmem:[%s3485_s0 + $0x8] sm:$0xff]  }
   0x6   :  { %2502 = vmatpush3.bf16.msra.mxu1 %v2917_v7  ;;  %v3111_v15 = vld [vmem:[%s3485_s0 + $0x10] sm:$0xff]   ;;  %v2922_v16 = vld [vmem:[%s3486_s3 + $0x28] sm:$0xff]   ;;  %v3124_v18 = vld [vmem:[%s3485_s0 + $0x18] sm:$0xff]  }
   0x7   :  { %2472 = vmatpush3.bf16.msra.mxu0 %v2902_v1  ;;  %2503 = vmatprep.subr.bf16.mxu1 %v2918_v8  ;;  %v2923_v17 = vld [vmem:[%s3486_s3 + $0x30] sm:$0xff]   ;;  %v3129_v19 = vld [vmem:[%s3485_s0 + $0x20] sm:$0xff]   ;;  %v3136_v20 = vld [vmem:[%s3485_s0 + $0x28] sm:$0xff]  }
   0x8   :  { %2473 = vmatprep.subr.bf16.mxu0 %v2903_v2  ;;  %v3141_v21 = vld [vmem:[%s3485_s0 + $0x30] sm:$0xff]   ;;  %v3148_v22 = vld [vmem:[%s3485_s0 + $0x38] sm:$0xff]   ;;  %v3157_v48 = vld [vmem:[%s3487_s1] sm:$0xff]  }
   0x9   :  { %v2924_v23 = vld [vmem:[%s3486_s3 + $0x38] sm:$0xff]   ;;  %v2933_v49 = vld [vmem:[%s3488_s4] sm:$0xff]   ;;  %v2934_v50 = vld [vmem:[%s3488_s4 + $0x8] sm:$0xff]  }
   0xa   :  { %2504 = vmatpush3.bf16.msra.mxu1 %v2918_v8  ;;  %v2935_v51 = vld [vmem:[%s3488_s4 + $0x10] sm:$0xff]   ;;  %v2936_v52 = vld [vmem:[%s3488_s4 + $0x18] sm:$0xff]   ;;  %v2937_v53 = vld [vmem:[%s3488_s4 + $0x20] sm:$0xff]  }
   0xb   :  { %2474 = vmatpush3.bf16.msra.mxu0 %v2903_v2  ;;  %2505 = vmatprep.subr.bf16.mxu1 %v2919_v10  ;;  %v2938_v54 = vld [vmem:[%s3488_s4 + $0x28] sm:$0xff]   ;;  %v2939_v55 = vld [vmem:[%s3488_s4 + $0x30] sm:$0xff]   ;;  %v3187_v59 = vld [vmem:[%s3489_s10] sm:$0xff] }
   0xc   :  { %2475 = vmatprep.subr.bf16.mxu0 %v2904_v3  ;;  %v292_v60 = vrot.slane %v3187_v59, %v291_v58 }
   0xe   :  { %2506 = vmatpush3.bf16.msra.mxu1 %v2919_v10 }
   0xf   :  { %2476 = vmatpush3.bf16.msra.mxu0 %v2904_v3  ;;  %2507 = vmatprep.subr.bf16.mxu1 %v2920_v12 }
  0x10   :  { %2477 = vmatprep.subr.bf16.mxu0 %v2905_v5 }
  0x12   :  { %2508 = vmatpush3.bf16.msra.mxu1 %v2920_v12 }
  0x13   :  { %2478 = vmatpush3.bf16.msra.mxu0 %v2905_v5  ;;  %2509 = vmatprep.subr.bf16.mxu1 %v2921_v13 }
  0x14   :  { %2479 = vmatprep.subr.bf16.mxu0 %v2906_v6 }
  0x16   :  { %2510 = vmatpush3.bf16.msra.mxu1 %v2921_v13 }
  0x17   :  { %2480 = vmatpush3.bf16.msra.mxu0 %v2906_v6  ;;  %2511 = vmatprep.subr.bf16.mxu1 %v2922_v16 }
  0x18   :  { %2481 = vmatprep.subr.bf16.mxu0 %v2907_v9 }
  0x1a   :  { %2512 = vmatpush3.bf16.msra.mxu1 %v2922_v16 }
  0x1b   :  { %2482 = vmatpush3.bf16.msra.mxu0 %v2907_v9  ;;  %2513 = vmatprep.subr.bf16.mxu1 %v2923_v17 }
  0x1c   :  { %2483 = vmatprep.subr.bf16.mxu0 %v2908_v11 }
  0x1e   :  { %2514 = vmatpush3.bf16.msra.mxu1 %v2923_v17 }
  0x1f   :  { %2484 = vmatpush3.bf16.msra.mxu0 %v2908_v11  ;;  %2515 = vmatprep.subr.bf16.mxu1 %v2924_v23 }
  0x22   :  { %2486 = vmatmul.mubr.bf16.vlgmr.msra.gmra.mrb[0].mxu0 %v3106_v14  ;;  %2516 = vmatpush3.bf16.msra.mxu1 %v2924_v23 }
  0x23   :  { %2489 = vmatprep.mubr.bf16.mxu0 %v3111_v15  ;;  %2565 = vmatprep.subr.bf16.mxu1 %v2933_v49 }
  0x2a   :  { %2490 = vmatmul.mubr.bf16.gmra.mrb[4].mxu0 %v3124_v18 }
  0x2b   :  { %2493 = vmatprep.mubr.bf16.mxu0 %v3129_v19 }
  0x32   :  { %2494 = vmatmul.mubr.bf16.gmra.mrb[8].mxu0 %v3136_v20 }
  0x33   :  { %2497 = vmatprep.mubr.bf16.mxu0 %v3141_v21 }
  0x3a   :  { %2498 = vmatmul.mubr.bf16.gmra.mrb[12].mxu0 %v3148_v22 }
  0x3b   :  { %2549 = vmatprep.mubr.bf16.mxu0 %v3157_v48 }
  0xf5   :  { %v2487_v24 = vpop.f32.mrb[0].mxu0 }
  0xf6   :  { %v218_v25 = vpop.f32.mrb[1].mxu0 }
  0xf7   :  { %v2488_v26 = vpop.f32.mrb[2].mxu0 }
  0xf8   :  { %v282_v27 = vpack.c.bf16 %v2488_v26, %v2487_v24  ;;  %v221_v28 = vpop.f32.mrb[3].mxu0 }
  0xf9   :  { %v281_v29 = vpack.c.bf16 %v221_v28, %v218_v25 }
  0xfb   :  { %2517 = vmatprep.mubr.bf16.mxu1 %v281_v29 }
  0xfc   :  { %2518 = vmatmul.mubr.bf16.vlgmr.msra.gmra.mrb[0].mxu1 %v282_v27 }
  0xfd   :  { %v2491_v30 = vpop.f32.mrb[4].mxu0  ;;  %2566 = vmatpush3.bf16.msra.mxu1 %v2933_v49 }
  0xfe   :  { %v234_v31 = vpop.f32.mrb[5].mxu0  ;;  %2567 = vmatprep.subr.bf16.mxu1 %v2934_v50 }
  0xff   :  { %v2492_v32 = vpop.f32.mrb[6].mxu0 }
 0x100   :  { %v284_v33 = vpack.c.bf16 %v2492_v32, %v2491_v30  ;;  %v237_v34 = vpop.f32.mrb[7].mxu0 }
 0x101   :  { %v283_v35 = vpack.c.bf16 %v237_v34, %v234_v31  ;;  %2568 = vmatpush3.bf16.msra.mxu1 %v2934_v50 }
 0x102   :  { %2569 = vmatprep.subr.bf16.mxu1 %v2935_v51 }
 0x103   :  { %2521 = vmatprep.mubr.bf16.mxu1 %v283_v35 }
 0x104   :  { %2522 = vmatmul.mubr.bf16.gmra.mrb[4].mxu1 %v284_v33 }
 0x105   :  { %v2495_v36 = vpop.f32.mrb[8].mxu0  ;;  %2570 = vmatpush3.bf16.msra.mxu1 %v2935_v51 }
 0x106   :  { %v250_v37 = vpop.f32.mrb[9].mxu0  ;;  %2571 = vmatprep.subr.bf16.mxu1 %v2936_v52 }
 0x107   :  { %v2496_v38 = vpop.f32.mrb[10].mxu0 }
 0x108   :  { %v286_v39 = vpack.c.bf16 %v2496_v38, %v2495_v36  ;;  %v253_v40 = vpop.f32.mrb[11].mxu0 }
 0x109   :  { %v285_v41 = vpack.c.bf16 %v253_v40, %v250_v37  ;;  %2572 = vmatpush3.bf16.msra.mxu1 %v2936_v52 }
 0x10a   :  { %2573 = vmatprep.subr.bf16.mxu1 %v2937_v53 }
 0x10b   :  { %2525 = vmatprep.mubr.bf16.mxu1 %v285_v41 }
 0x10c   :  { %2526 = vmatmul.mubr.bf16.gmra.mrb[8].mxu1 %v286_v39 }
 0x10d   :  { %v2499_v42 = vpop.f32.mrb[12].mxu0  ;;  %2574 = vmatpush3.bf16.msra.mxu1 %v2937_v53 }
 0x10e   :  { %v266_v43 = vpop.f32.mrb[13].mxu0  ;;  %2575 = vmatprep.subr.bf16.mxu1 %v2938_v54 }
 0x10f   :  { %v2500_v44 = vpop.f32.mrb[14].mxu0 }
 0x110   :  { %v288_v45 = vpack.c.bf16 %v2500_v44, %v2499_v42  ;;  %v269_v46 = vpop.f32.mrb[15].mxu0 }
 0x111   :  { %v287_v47 = vpack.c.bf16 %v269_v46, %v266_v43  ;;  %2576 = vmatpush3.bf16.msra.mxu1 %v2938_v54 }
 0x112   :  { %2577 = vmatprep.subr.bf16.mxu1 %v2939_v55 }
 0x113   :  { %2529 = vmatprep.mubr.bf16.mxu1 %v287_v47 }
 0x114   :  { %2530 = vmatmul.mubr.bf16.gmra.mrb[12].mxu1 %v288_v45 }
 0x115   :  { %2578 = vmatpush3.bf16.msra.mxu1 %v2939_v55 }
 0x1cf   :  { %v2519_v61 = vpop.f32.mrb[0].mxu1 }
 0x1d0   :  { %v384_v62 = vadd.f32 %v2519_v61, %v292_v60  ;;  %v375_v63 = vpop.f32.mrb[1].mxu1 }
 0x1d1   :  { %v376_v0 = vadd.f32 %v375_v63, %v292_v60  ;;  %v2520_v1 = vpop.f32.mrb[2].mxu1 }
 0x1d2   :  { %v387_v2 = vadd.f32 %v2520_v1, %v292_v60  ;;  %v378_v3 = vpop.f32.mrb[3].mxu1  ;;  %v440_v6 = vmax.f32 %v384_v62, 0.0  ;;  %v3193_v1 = vld [vmem:[%s3487_s1 + $0x8] sm:$0xff]  }
 0x1d3   :  { %v379_v5 = vadd.f32 %v378_v3, %v292_v60  ;;  %v438_v8 = vmax.f32 %v376_v0, 0.0  ;;  %v3210_v3 = vld [vmem:[%s3487_s1 + $0x20] sm:$0xff]  }
 0x1d4   :  { %v441_v7 = vmax.f32 %v387_v2, 0.0  ;;  %v3205_v2 = vld [vmem:[%s3487_s1 + $0x18] sm:$0xff]  }
 0x1d5   :  { %v439_v9 = vmax.f32 %v379_v5, 0.0  ;;  %v3217_v5 = vld [vmem:[%s3487_s1 + $0x28] sm:$0xff]  }
 0x1d6   :  { %v455_v10 = vpack.c.bf16 %v441_v7, %v440_v6  ;;  %v3222_v6 = vld [vmem:[%s3487_s1 + $0x30] sm:$0xff]   ;;  %v3229_v7 = vld [vmem:[%s3487_s1 + $0x38] sm:$0xff]  }
 0x1d7   :  { %v454_v11 = vpack.c.bf16 %v439_v9, %v438_v8  ;;  %v2523_v12 = vpop.f32.mrb[4].mxu1  ;;  %v2940_v8 = vld [vmem:[%s3488_s4 + $0x38] sm:$0xff]  }
 0x1d8   :  { %v400_v13 = vadd.f32 %v2523_v12, %v292_v60  ;;  %v391_v16 = vpop.f32.mrb[5].mxu1  ;;  %2579 = vmatprep.subr.bf16.mxu1 %v2940_v8 }
 0x1d9   :  { %v392_v17 = vadd.f32 %v391_v16, %v292_v60  ;;  %v2524_v23 = vpop.f32.mrb[6].mxu1  ;;  %2533 = vmatprep.subr.bf16.mxu0 %v454_v11  ;;  %2580 = vmatpush3.bf16.msra.mxu1 %v2940_v8 }
 0x1da   :  { %v403_v24 = vadd.f32 %v2524_v23, %v292_v60  ;;  %v394_v25 = vpop.f32.mrb[7].mxu1  ;;  %2534 = vmatpush3.bf16.msra.mxu0 %v454_v11  ;;  %v444_v27 = vmax.f32 %v400_v13, 0.0 }
 0x1db   :  { %v395_v26 = vadd.f32 %v394_v25, %v292_v60  ;;  %2535 = vmatprep.subr.bf16.mxu0 %v455_v10  ;;  %v442_v29 = vmax.f32 %v392_v17, 0.0 }
 0x1dc   :  { %v445_v28 = vmax.f32 %v403_v24, 0.0 }
 0x1dd   :  { %v443_v30 = vmax.f32 %v395_v26, 0.0 }
 0x1de   :  { %v457_v31 = vpack.c.bf16 %v445_v28, %v444_v27  ;;  %2536 = vmatpush3.bf16.msra.mxu0 %v455_v10 }
 0x1df   :  { %v456_v32 = vpack.c.bf16 %v443_v30, %v442_v29  ;;  %v2527_v33 = vpop.f32.mrb[8].mxu1 }
 0x1e0   :  { %v416_v34 = vadd.f32 %v2527_v33, %v292_v60  ;;  %v407_v35 = vpop.f32.mrb[9].mxu1 }
 0x1e1   :  { %v408_v36 = vadd.f32 %v407_v35, %v292_v60  ;;  %v2528_v37 = vpop.f32.mrb[10].mxu1  ;;  %2537 = vmatprep.subr.bf16.mxu0 %v456_v32 }
 0x1e2   :  { %v419_v38 = vadd.f32 %v2528_v37, %v292_v60  ;;  %v410_v39 = vpop.f32.mrb[11].mxu1  ;;  %2538 = vmatpush3.bf16.msra.mxu0 %v456_v32  ;;  %v448_v41 = vmax.f32 %v416_v34, 0.0 }
 0x1e3   :  { %v411_v40 = vadd.f32 %v410_v39, %v292_v60  ;;  %2539 = vmatprep.subr.bf16.mxu0 %v457_v31  ;;  %v446_v43 = vmax.f32 %v408_v36, 0.0  ;;  %v2941_v39 = vld [vmem:[%s3490_s5] sm:$0xff]  }
 0x1e4   :  { %v449_v42 = vmax.f32 %v419_v38, 0.0  ;;  %2629 = vmatprep.subr.bf16.mxu1 %v2941_v39 }
 0x1e5   :  { %v447_v44 = vmax.f32 %v411_v40, 0.0  ;;  %v2942_v40 = vld [vmem:[%s3490_s5 + $0x8] sm:$0xff]  }
 0x1e6   :  { %v459_v45 = vpack.c.bf16 %v449_v42, %v448_v41  ;;  %2540 = vmatpush3.bf16.msra.mxu0 %v457_v31  ;;  %v2943_v41 = vld [vmem:[%s3490_s5 + $0x10] sm:$0xff]   ;;  %v2944_v42 = vld [vmem:[%s3490_s5 + $0x18] sm:$0xff]  }
 0x1e7   :  { %v458_v46 = vpack.c.bf16 %v447_v44, %v446_v43  ;;  %v2531_v47 = vpop.f32.mrb[12].mxu1  ;;  %v2945_v43 = vld [vmem:[%s3490_s5 + $0x20] sm:$0xff]   ;;  %v2946_v44 = vld [vmem:[%s3490_s5 + $0x28] sm:$0xff]  }
 0x1e8   :  { %v432_v49 = vadd.f32 %v2531_v47, %v292_v60  ;;  %v423_v50 = vpop.f32.mrb[13].mxu1 }
 0x1e9   :  { %v424_v51 = vadd.f32 %v423_v50, %v292_v60  ;;  %v2532_v52 = vpop.f32.mrb[14].mxu1  ;;  %2541 = vmatprep.subr.bf16.mxu0 %v458_v46 }
 0x1ea   :  { %v435_v53 = vadd.f32 %v2532_v52, %v292_v60  ;;  %v426_v54 = vpop.f32.mrb[15].mxu1  ;;  %2542 = vmatpush3.bf16.msra.mxu0 %v458_v46  ;;  %v452_v56 = vmax.f32 %v432_v49, 0.0  ;;  %v649_v46 = vsub.s32 1, %v3181_v57 }
 0x1eb   :  { %v427_v55 = vadd.f32 %v426_v54, %v292_v60  ;;  %2543 = vmatprep.subr.bf16.mxu0 %v459_v45  ;;  %v450_v61 = vmax.f32 %v424_v51, 0.0  ;;  %v3198_v60 = vld [vmem:[%s3487_s1 + $0x10] sm:$0xff]  }
 0x1ec   :  { %v453_v58 = vmax.f32 %v435_v53, 0.0  ;;  %v650_v47 = vrot.slane %v3187_v59, %v649_v46 }
 0x1ed   :  { %v451_v62 = vmax.f32 %v427_v55, 0.0 }
 0x1ee   :  { %v461_v63 = vpack.c.bf16 %v453_v58, %v452_v56  ;;  %2544 = vmatpush3.bf16.msra.mxu0 %v459_v45  ;;  %v2947_v45 = vld [vmem:[%s3490_s5 + $0x30] sm:$0xff]  }
 0x1ef   :  { %v460_v0 = vpack.c.bf16 %v451_v62, %v450_v61 }
 0x1f1   :  { %2545 = vmatprep.subr.bf16.mxu0 %v460_v0 }
 0x1f2   :  { %2546 = vmatpush3.bf16.msra.mxu0 %v460_v0 }
 0x1f3   :  { %2547 = vmatprep.subr.bf16.mxu0 %v461_v63 }
 0x1f6   :  { %2548 = vmatpush3.bf16.msra.mxu0 %v461_v63 }
 0x1f9   :  { %2550 = vmatmul.mubr.bf16.vlgmr.msra.gmra.mrb[16].mxu0 %v3193_v1 }
 0x1fa   :  { %2553 = vmatprep.mubr.bf16.mxu0 %v3198_v60 }
 0x201   :  { %2554 = vmatmul.mubr.bf16.gmra.mrb[20].mxu0 %v3205_v2 }
 0x202   :  { %2557 = vmatprep.mubr.bf16.mxu0 %v3210_v3 }
 0x209   :  { %2558 = vmatmul.mubr.bf16.gmra.mrb[24].mxu0 %v3217_v5 }
 0x20a   :  { %2561 = vmatprep.mubr.bf16.mxu0 %v3222_v6 }
 0x211   :  { %2562 = vmatmul.mubr.bf16.gmra.mrb[28].mxu0 %v3229_v7 }
 0x212   :  { %2613 = vmatprep.mubr.bf16.mxu0 %v3073_v4 }
 0x2cc   :  { %v2551_v9 = vpop.f32.mrb[16].mxu0 }
 0x2cd   :  { %v576_v10 = vpop.f32.mrb[17].mxu0 }
 0x2ce   :  { %v2552_v11 = vpop.f32.mrb[18].mxu0 }
 0x2cf   :  { %v640_v12 = vpack.c.bf16 %v2552_v11, %v2551_v9  ;;  %v579_v13 = vpop.f32.mrb[19].mxu0 }
 0x2d0   :  { %v639_v16 = vpack.c.bf16 %v579_v13, %v576_v10 }
 0x2d2   :  { %2581 = vmatprep.mubr.bf16.mxu1 %v639_v16 }
 0x2d3   :  { %2582 = vmatmul.mubr.bf16.vlgmr.msra.gmra.mrb[16].mxu1 %v640_v12 }
 0x2d4   :  { %v2555_v17 = vpop.f32.mrb[20].mxu0  ;;  %2630 = vmatpush3.bf16.msra.mxu1 %v2941_v39 }
 0x2d5   :  { %v592_v23 = vpop.f32.mrb[21].mxu0  ;;  %2631 = vmatprep.subr.bf16.mxu1 %v2942_v40 }
 0x2d6   :  { %v2556_v24 = vpop.f32.mrb[22].mxu0 }
 0x2d7   :  { %v642_v25 = vpack.c.bf16 %v2556_v24, %v2555_v17  ;;  %v595_v26 = vpop.f32.mrb[23].mxu0 }
 0x2d8   :  { %v641_v4 = vpack.c.bf16 %v595_v26, %v592_v23  ;;  %2632 = vmatpush3.bf16.msra.mxu1 %v2942_v40 }
 0x2d9   :  { %2633 = vmatprep.subr.bf16.mxu1 %v2943_v41 }
 0x2da   :  { %2585 = vmatprep.mubr.bf16.mxu1 %v641_v4 }
 0x2db   :  { %2586 = vmatmul.mubr.bf16.gmra.mrb[20].mxu1 %v642_v25 }
 0x2dc   :  { %v2559_v27 = vpop.f32.mrb[24].mxu0  ;;  %2634 = vmatpush3.bf16.msra.mxu1 %v2943_v41 }
 0x2dd   :  { %v608_v28 = vpop.f32.mrb[25].mxu0  ;;  %2635 = vmatprep.subr.bf16.mxu1 %v2944_v42 }
 0x2de   :  { %v2560_v29 = vpop.f32.mrb[26].mxu0 }
 0x2df   :  { %v644_v30 = vpack.c.bf16 %v2560_v29, %v2559_v27  ;;  %v611_v31 = vpop.f32.mrb[27].mxu0 }
 0x2e0   :  { %v643_v32 = vpack.c.bf16 %v611_v31, %v608_v28  ;;  %2636 = vmatpush3.bf16.msra.mxu1 %v2944_v42 }
 0x2e1   :  { %2637 = vmatprep.subr.bf16.mxu1 %v2945_v43 }
 0x2e2   :  { %2589 = vmatprep.mubr.bf16.mxu1 %v643_v32 }
 0x2e3   :  { %2590 = vmatmul.mubr.bf16.gmra.mrb[24].mxu1 %v644_v30 }
 0x2e4   :  { %v2563_v33 = vpop.f32.mrb[28].mxu0  ;;  %2638 = vmatpush3.bf16.msra.mxu1 %v2945_v43 }
 0x2e5   :  { %v624_v34 = vpop.f32.mrb[29].mxu0  ;;  %2639 = vmatprep.subr.bf16.mxu1 %v2946_v44 }
 0x2e6   :  { %v2564_v35 = vpop.f32.mrb[30].mxu0 }
 0x2e7   :  { %v646_v36 = vpack.c.bf16 %v2564_v35, %v2563_v33  ;;  %v627_v37 = vpop.f32.mrb[31].mxu0 }
 0x2e8   :  { %v645_v38 = vpack.c.bf16 %v627_v37, %v624_v34  ;;  %2640 = vmatpush3.bf16.msra.mxu1 %v2946_v44 }
 0x2e9   :  { %2641 = vmatprep.subr.bf16.mxu1 %v2947_v45 }
 0x2ea   :  { %2593 = vmatprep.mubr.bf16.mxu1 %v645_v38 }
 0x2eb   :  { %2594 = vmatmul.mubr.bf16.gmra.mrb[28].mxu1 %v646_v36 }
 0x2ec   :  { %2642 = vmatpush3.bf16.msra.mxu1 %v2947_v45 }
 0x3a6   :  { %v2583_v49 = vpop.f32.mrb[16].mxu1 }
 0x3a7   :  { %v742_v50 = vadd.f32 %v2583_v49, %v650_v47  ;;  %v733_v51 = vpop.f32.mrb[17].mxu1 }
 0x3a8   :  { %v734_v52 = vadd.f32 %v733_v51, %v650_v47  ;;  %v2584_v53 = vpop.f32.mrb[18].mxu1 }
 0x3a9   :  { %v745_v54 = vadd.f32 %v2584_v53, %v650_v47  ;;  %v736_v55 = vpop.f32.mrb[19].mxu1  ;;  %v798_v58 = vmax.f32 %v742_v50, 0.0 }
 0x3aa   :  { %v737_v56 = vadd.f32 %v736_v55, %v650_v47  ;;  %v796_v62 = vmax.f32 %v734_v52, 0.0 }
 0x3ab   :  { %v799_v61 = vmax.f32 %v745_v54, 0.0 }
 0x3ac   :  { %v797_v63 = vmax.f32 %v737_v56, 0.0 }
 0x3ad   :  { %v813_v0 = vpack.c.bf16 %v799_v61, %v798_v58 }
 0x3ae   :  { %v812_v8 = vpack.c.bf16 %v797_v63, %v796_v62  ;;  %v2587_v9 = vpop.f32.mrb[20].mxu1 }
 0x3af   :  { %v758_v10 = vadd.f32 %v2587_v9, %v650_v47  ;;  %v749_v11 = vpop.f32.mrb[21].mxu1 }
 0x3b0   :  { %v750_v12 = vadd.f32 %v749_v11, %v650_v47  ;;  %v2588_v13 = vpop.f32.mrb[22].mxu1  ;;  %2597 = vmatprep.subr.bf16.mxu0 %v812_v8 }
 0x3b1   :  { %v761_v16 = vadd.f32 %v2588_v13, %v650_v47  ;;  %v752_v17 = vpop.f32.mrb[23].mxu1  ;;  %2598 = vmatpush3.bf16.msra.mxu0 %v812_v8  ;;  %v802_v24 = vmax.f32 %v758_v10, 0.0 }
 0x3b2   :  { %v753_v23 = vadd.f32 %v752_v17, %v650_v47  ;;  %2599 = vmatprep.subr.bf16.mxu0 %v813_v0  ;;  %v800_v26 = vmax.f32 %v750_v12, 0.0 }
 0x3b3   :  { %v803_v25 = vmax.f32 %v761_v16, 0.0 }
 0x3b4   :  { %v801_v4 = vmax.f32 %v753_v23, 0.0 }
 0x3b5   :  { %v815_v27 = vpack.c.bf16 %v803_v25, %v802_v24  ;;  %2600 = vmatpush3.bf16.msra.mxu0 %v813_v0 }
 0x3b6   :  { %v814_v28 = vpack.c.bf16 %v801_v4, %v800_v26  ;;  %v2591_v29 = vpop.f32.mrb[24].mxu1 }
 0x3b7   :  { %v774_v30 = vadd.f32 %v2591_v29, %v650_v47  ;;  %v765_v31 = vpop.f32.mrb[25].mxu1  ;;  %v2951_v29 = vld [vmem:[%s3491_s6 + $0x10] sm:$0xff]  }
 0x3b8   :  { %v766_v32 = vadd.f32 %v765_v31, %v650_v47  ;;  %v2592_v33 = vpop.f32.mrb[26].mxu1  ;;  %2601 = vmatprep.subr.bf16.mxu0 %v814_v28  ;;  %v2953_v31 = vld [vmem:[%s3491_s6 + $0x20] sm:$0xff]  }
 0x3b9   :  { %v777_v34 = vadd.f32 %v2592_v33, %v650_v47  ;;  %v768_v35 = vpop.f32.mrb[27].mxu1  ;;  %2602 = vmatpush3.bf16.msra.mxu0 %v814_v28  ;;  %v806_v37 = vmax.f32 %v774_v30, 0.0  ;;  %v2950_v28 = vld [vmem:[%s3491_s6 + $0x8] sm:$0xff]   ;;  %v2952_v30 = vld [vmem:[%s3491_s6 + $0x18] sm:$0xff]   ;;  %v2955_v33 = vld [vmem:[%s3491_s6 + $0x30] sm:$0xff]  }
 0x3ba   :  { %v769_v36 = vadd.f32 %v768_v35, %v650_v47  ;;  %2603 = vmatprep.subr.bf16.mxu0 %v815_v27  ;;  %v804_v39 = vmax.f32 %v766_v32, 0.0  ;;  %v2954_v32 = vld [vmem:[%s3491_s6 + $0x28] sm:$0xff]  }
 0x3bb   :  { %v807_v38 = vmax.f32 %v777_v34, 0.0  ;;  %v943_v34 = vsub.s32 2, %v3181_v57 }
 0x3bc   :  { %v805_v40 = vmax.f32 %v769_v36, 0.0 }
 0x3bd   :  { %v817_v41 = vpack.c.bf16 %v807_v38, %v806_v37  ;;  %2604 = vmatpush3.bf16.msra.mxu0 %v815_v27  ;;  %v2949_v27 = vld [vmem:[%s3491_s6] sm:$0xff]   ;;  %v944_v35 = vrot.slane %v3187_v59, %v943_v34 }
 0x3be   :  { %v816_v42 = vpack.c.bf16 %v805_v40, %v804_v39  ;;  %v2595_v43 = vpop.f32.mrb[28].mxu1 }
 0x3bf   :  { %v790_v44 = vadd.f32 %v2595_v43, %v650_v47  ;;  %v781_v45 = vpop.f32.mrb[29].mxu1 }
 0x3c0   :  { %v782_v46 = vadd.f32 %v781_v45, %v650_v47  ;;  %v2596_v49 = vpop.f32.mrb[30].mxu1  ;;  %2605 = vmatprep.subr.bf16.mxu0 %v816_v42 }
 0x3c1   :  { %v793_v50 = vadd.f32 %v2596_v49, %v650_v47  ;;  %v784_v51 = vpop.f32.mrb[31].mxu1  ;;  %2606 = vmatpush3.bf16.msra.mxu0 %v816_v42  ;;  %v810_v53 = vmax.f32 %v790_v44, 0.0 }
 0x3c2   :  { %v785_v52 = vadd.f32 %v784_v51, %v650_v47  ;;  %2607 = vmatprep.subr.bf16.mxu0 %v817_v41  ;;  %v808_v55 = vmax.f32 %v782_v46, 0.0  ;;  %v2948_v47 = vld [vmem:[%s3490_s5 + $0x38] sm:$0xff]  }
 0x3c3   :  { %v811_v54 = vmax.f32 %v793_v50, 0.0  ;;  %2643 = vmatprep.subr.bf16.mxu1 %v2948_v47 }
 0x3c4   :  { %v809_v56 = vmax.f32 %v785_v52, 0.0  ;;  %2644 = vmatpush3.bf16.msra.mxu1 %v2948_v47 }
 0x3c5   :  { %v819_v58 = vpack.c.bf16 %v811_v54, %v810_v53  ;;  %2608 = vmatpush3.bf16.msra.mxu0 %v817_v41  ;;  %2693 = vmatprep.subr.bf16.mxu1 %v2949_v27 }
 0x3c6   :  { %v818_v61 = vpack.c.bf16 %v809_v56, %v808_v55 }
 0x3c8   :  { %2609 = vmatprep.subr.bf16.mxu0 %v818_v61 }
 0x3c9   :  { %2610 = vmatpush3.bf16.msra.mxu0 %v818_v61 }
 0x3ca   :  { %2611 = vmatprep.subr.bf16.mxu0 %v819_v58 }
 0x3cd   :  { %2612 = vmatpush3.bf16.msra.mxu0 %v819_v58 }
 0x3d0   :  { %2614 = vmatmul.mubr.bf16.vlgmr.msra.gmra.mrb[32].mxu0 %v3106_v14 }
 0x3d1   :  { %2617 = vmatprep.mubr.bf16.mxu0 %v3111_v15 }
 0x3d8   :  { %2618 = vmatmul.mubr.bf16.gmra.mrb[36].mxu0 %v3124_v18 }
 0x3d9   :  { %2621 = vmatprep.mubr.bf16.mxu0 %v3129_v19 }
 0x3e0   :  { %2622 = vmatmul.mubr.bf16.gmra.mrb[40].mxu0 %v3136_v20 }
 0x3e1   :  { %2625 = vmatprep.mubr.bf16.mxu0 %v3141_v21 }
 0x3e8   :  { %2626 = vmatmul.mubr.bf16.gmra.mrb[44].mxu0 %v3148_v22 }
 0x3e9   :  { %2677 = vmatprep.mubr.bf16.mxu0 %v3157_v48 }
 0x4a3   :  { %v2615_v14 = vpop.f32.mrb[32].mxu0 }
 0x4a4   :  { %v870_v15 = vpop.f32.mrb[33].mxu0 }
 0x4a5   :  { %v2616_v62 = vpop.f32.mrb[34].mxu0 }
 0x4a6   :  { %v934_v18 = vpack.c.bf16 %v2616_v62, %v2615_v14  ;;  %v873_v63 = vpop.f32.mrb[35].mxu0 }
 0x4a7   :  { %v933_v19 = vpack.c.bf16 %v873_v63, %v870_v15 }
 0x4a9   :  { %2645 = vmatprep.mubr.bf16.mxu1 %v933_v19 }
 0x4aa   :  { %2646 = vmatmul.mubr.bf16.vlgmr.msra.gmra.mrb[32].mxu1 %v934_v18 }
 0x4ab   :  { %v2619_v20 = vpop.f32.mrb[36].mxu0  ;;  %2694 = vmatpush3.bf16.msra.mxu1 %v2949_v27 }
 0x4ac   :  { %v886_v21 = vpop.f32.mrb[37].mxu0  ;;  %2695 = vmatprep.subr.bf16.mxu1 %v2950_v28 }
 0x4ad   :  { %v2620_v0 = vpop.f32.mrb[38].mxu0 }
 0x4ae   :  { %v936_v22 = vpack.c.bf16 %v2620_v0, %v2619_v20  ;;  %v889_v8 = vpop.f32.mrb[39].mxu0 }
 0x4af   :  { %v935_v48 = vpack.c.bf16 %v889_v8, %v886_v21  ;;  %2696 = vmatpush3.bf16.msra.mxu1 %v2950_v28 }
 0x4b0   :  { %2697 = vmatprep.subr.bf16.mxu1 %v2951_v29 }
 0x4b1   :  { %2649 = vmatprep.mubr.bf16.mxu1 %v935_v48 }
 0x4b2   :  { %2650 = vmatmul.mubr.bf16.gmra.mrb[36].mxu1 %v936_v22 }
 0x4b3   :  { %v2623_v9 = vpop.f32.mrb[40].mxu0  ;;  %2698 = vmatpush3.bf16.msra.mxu1 %v2951_v29 }
 0x4b4   :  { %v902_v10 = vpop.f32.mrb[41].mxu0  ;;  %2699 = vmatprep.subr.bf16.mxu1 %v2952_v30 }
 0x4b5   :  { %v2624_v11 = vpop.f32.mrb[42].mxu0 }
 0x4b6   :  { %v938_v12 = vpack.c.bf16 %v2624_v11, %v2623_v9  ;;  %v905_v13 = vpop.f32.mrb[43].mxu0 }
 0x4b7   :  { %v937_v16 = vpack.c.bf16 %v905_v13, %v902_v10  ;;  %2700 = vmatpush3.bf16.msra.mxu1 %v2952_v30 }
 0x4b8   :  { %2701 = vmatprep.subr.bf16.mxu1 %v2953_v31 }
 0x4b9   :  { %2653 = vmatprep.mubr.bf16.mxu1 %v937_v16 }
 0x4ba   :  { %2654 = vmatmul.mubr.bf16.gmra.mrb[40].mxu1 %v938_v12 }
 0x4bb   :  { %v2627_v17 = vpop.f32.mrb[44].mxu0  ;;  %2702 = vmatpush3.bf16.msra.mxu1 %v2953_v31 }
 0x4bc   :  { %v918_v23 = vpop.f32.mrb[45].mxu0  ;;  %2703 = vmatprep.subr.bf16.mxu1 %v2954_v32 }
 0x4bd   :  { %v2628_v24 = vpop.f32.mrb[46].mxu0 }
 0x4be   :  { %v940_v25 = vpack.c.bf16 %v2628_v24, %v2627_v17  ;;  %v921_v26 = vpop.f32.mrb[47].mxu0 }
 0x4bf   :  { %v939_v4 = vpack.c.bf16 %v921_v26, %v918_v23  ;;  %2704 = vmatpush3.bf16.msra.mxu1 %v2954_v32 }
 0x4c0   :  { %2705 = vmatprep.subr.bf16.mxu1 %v2955_v33 }
 0x4c1   :  { %2657 = vmatprep.mubr.bf16.mxu1 %v939_v4 }
 0x4c2   :  { %2658 = vmatmul.mubr.bf16.gmra.mrb[44].mxu1 %v940_v25 }
 0x4c3   :  { %2706 = vmatpush3.bf16.msra.mxu1 %v2955_v33 }
 0x57d   :  { %v2647_v36 = vpop.f32.mrb[32].mxu1 }
 0x57e   :  { %v1036_v37 = vadd.f32 %v2647_v36, %v944_v35  ;;  %v1027_v38 = vpop.f32.mrb[33].mxu1 }
 0x57f   :  { %v1028_v39 = vadd.f32 %v1027_v38, %v944_v35  ;;  %v2648_v40 = vpop.f32.mrb[34].mxu1 }
 0x580   :  { %v1039_v41 = vadd.f32 %v2648_v40, %v944_v35  ;;  %v1030_v42 = vpop.f32.mrb[35].mxu1  ;;  %v1092_v44 = vmax.f32 %v1036_v37, 0.0 }
 0x581   :  { %v1031_v43 = vadd.f32 %v1030_v42, %v944_v35  ;;  %v1090_v46 = vmax.f32 %v1028_v39, 0.0 }
 0x582   :  { %v1093_v45 = vmax.f32 %v1039_v41, 0.0 }
 0x583   :  { %v1091_v49 = vmax.f32 %v1031_v43, 0.0 }
 0x584   :  { %v1107_v50 = vpack.c.bf16 %v1093_v45, %v1092_v44 }
 0x585   :  { %v1106_v51 = vpack.c.bf16 %v1091_v49, %v1090_v46  ;;  %v2651_v52 = vpop.f32.mrb[36].mxu1 }
 0x586   :  { %v1052_v53 = vadd.f32 %v2651_v52, %v944_v35  ;;  %v1043_v54 = vpop.f32.mrb[37].mxu1 }
 0x587   :  { %v1044_v55 = vadd.f32 %v1043_v54, %v944_v35  ;;  %v2652_v56 = vpop.f32.mrb[38].mxu1  ;;  %2661 = vmatprep.subr.bf16.mxu0 %v1106_v51 }
 0x588   :  { %v1055_v58 = vadd.f32 %v2652_v56, %v944_v35  ;;  %v1046_v61 = vpop.f32.mrb[39].mxu1  ;;  %2662 = vmatpush3.bf16.msra.mxu0 %v1106_v51  ;;  %v1096_v14 = vmax.f32 %v1052_v53, 0.0 }
 0x589   :  { %v1047_v47 = vadd.f32 %v1046_v61, %v944_v35  ;;  %2663 = vmatprep.subr.bf16.mxu0 %v1107_v50  ;;  %v1094_v62 = vmax.f32 %v1044_v55, 0.0  ;;  %v2957_v61 = vld [vmem:[%s3492_s7] sm:$0xff]  }
 0x58a   :  { %v1097_v15 = vmax.f32 %v1055_v58, 0.0 }
 0x58b   :  { %v1095_v18 = vmax.f32 %v1047_v47, 0.0  ;;  %v2958_v47 = vld [vmem:[%s3492_s7 + $0x8] sm:$0xff]  }
 0x58c   :  { %v1109_v63 = vpack.c.bf16 %v1097_v15, %v1096_v14  ;;  %2664 = vmatpush3.bf16.msra.mxu0 %v1107_v50  ;;  %v2959_v14 = vld [vmem:[%s3492_s7 + $0x10] sm:$0xff]   ;;  %v2960_v15 = vld [vmem:[%s3492_s7 + $0x18] sm:$0xff]  }
 0x58d   :  { %v1108_v19 = vpack.c.bf16 %v1095_v18, %v1094_v62  ;;  %v2655_v20 = vpop.f32.mrb[40].mxu1  ;;  %v2961_v62 = vld [vmem:[%s3492_s7 + $0x20] sm:$0xff]   ;;  %v2962_v18 = vld [vmem:[%s3492_s7 + $0x28] sm:$0xff]  }
 0x58e   :  { %v1068_v21 = vadd.f32 %v2655_v20, %v944_v35  ;;  %v1059_v0 = vpop.f32.mrb[41].mxu1 }
 0x58f   :  { %v1060_v22 = vadd.f32 %v1059_v0, %v944_v35  ;;  %v2656_v8 = vpop.f32.mrb[42].mxu1  ;;  %2665 = vmatprep.subr.bf16.mxu0 %v1108_v19 }
 0x590   :  { %v1071_v48 = vadd.f32 %v2656_v8, %v944_v35  ;;  %v1062_v9 = vpop.f32.mrb[43].mxu1  ;;  %2666 = vmatpush3.bf16.msra.mxu0 %v1108_v19  ;;  %v1100_v11 = vmax.f32 %v1068_v21, 0.0  ;;  %v1237_v19 = vsub.s32 3, %v3181_v57 }
 0x591   :  { %v1063_v10 = vadd.f32 %v1062_v9, %v944_v35  ;;  %2667 = vmatprep.subr.bf16.mxu0 %v1109_v63  ;;  %v1098_v13 = vmax.f32 %v1060_v22, 0.0 }
 0x592   :  { %v1101_v12 = vmax.f32 %v1071_v48, 0.0  ;;  %v1238_v20 = vrot.slane %v3187_v59, %v1237_v19  ;;  %v2987_v19 = vld [vmem:[%s3485_s0 + $0x30] sm:$0xff]  }
 0x593   :  { %v1099_v16 = vmax.f32 %v1063_v10, 0.0 }
 0x594   :  { %v1111_v17 = vpack.c.bf16 %v1101_v12, %v1100_v11  ;;  %2668 = vmatpush3.bf16.msra.mxu0 %v1109_v63  ;;  %v2963_v63 = vld [vmem:[%s3492_s7 + $0x30] sm:$0xff]  }
 0x595   :  { %v1110_v23 = vpack.c.bf16 %v1099_v16, %v1098_v13  ;;  %v2659_v24 = vpop.f32.mrb[44].mxu1 }
 0x596   :  { %v1084_v25 = vadd.f32 %v2659_v24, %v944_v35  ;;  %v1075_v26 = vpop.f32.mrb[45].mxu1 }
 0x597   :  { %v1076_v4 = vadd.f32 %v1075_v26, %v944_v35  ;;  %v2660_v27 = vpop.f32.mrb[46].mxu1  ;;  %2669 = vmatprep.subr.bf16.mxu0 %v1110_v23 }
 0x598   :  { %v1087_v28 = vadd.f32 %v2660_v27, %v944_v35  ;;  %v1078_v29 = vpop.f32.mrb[47].mxu1  ;;  %2670 = vmatpush3.bf16.msra.mxu0 %v1110_v23  ;;  %v1104_v31 = vmax.f32 %v1084_v25, 0.0 }
 0x599   :  { %v1079_v30 = vadd.f32 %v1078_v29, %v944_v35  ;;  %2671 = vmatprep.subr.bf16.mxu0 %v1111_v17  ;;  %v1102_v33 = vmax.f32 %v1076_v4, 0.0  ;;  %v2981_v35 = vld [vmem:[%s3485_s0] sm:$0xff]  }
 0x59a   :  { %v1105_v32 = vmax.f32 %v1087_v28, 0.0 }
 0x59b   :  { %v1103_v34 = vmax.f32 %v1079_v30, 0.0 }
 0x59c   :  { %v1113_v36 = vpack.c.bf16 %v1105_v32, %v1104_v31  ;;  %2672 = vmatpush3.bf16.msra.mxu0 %v1111_v17 }
 0x59d   :  { %v1112_v37 = vpack.c.bf16 %v1103_v34, %v1102_v33 }
 0x59f   :  { %2673 = vmatprep.subr.bf16.mxu0 %v1112_v37 }
 0x5a0   :  { %2674 = vmatpush3.bf16.msra.mxu0 %v1112_v37 }
 0x5a1   :  { %2675 = vmatprep.subr.bf16.mxu0 %v1113_v36 }
 0x5a4   :  { %2676 = vmatpush3.bf16.msra.mxu0 %v1113_v36 }
 0x5a7   :  { %2678 = vmatmul.mubr.bf16.vlgmr.msra.gmra.mrb[48].mxu0 %v3193_v1  ;;  %v2956_v1 = vld [vmem:[%s3491_s6 + $0x38] sm:$0xff]  }
 0x5a8   :  { %2681 = vmatprep.mubr.bf16.mxu0 %v3198_v60  ;;  %2707 = vmatprep.subr.bf16.mxu1 %v2956_v1 }
 0x5a9   :  { %2708 = vmatpush3.bf16.msra.mxu1 %v2956_v1 }
 0x5aa   :  { %2757 = vmatprep.subr.bf16.mxu1 %v2957_v61 }
 0x5af   :  { %2682 = vmatmul.mubr.bf16.gmra.mrb[52].mxu0 %v3205_v2 }
 0x5b0   :  { %2685 = vmatprep.mubr.bf16.mxu0 %v3210_v3 }
 0x5b7   :  { %2686 = vmatmul.mubr.bf16.gmra.mrb[56].mxu0 %v3217_v5 }
 0x5b8   :  { %2689 = vmatprep.mubr.bf16.mxu0 %v3222_v6 }
 0x5bf   :  { %2690 = vmatmul.mubr.bf16.gmra.mrb[60].mxu0 %v3229_v7 }
 0x5c0   :  { %2741 = vmatprep.mubr.bf16.mxu0 %v2981_v35 }
 0x67a   :  { %v2679_v60 = vpop.f32.mrb[48].mxu0 }
 0x67b   :  { %v1164_v2 = vpop.f32.mrb[49].mxu0 }
 0x67c   :  { %v2680_v3 = vpop.f32.mrb[50].mxu0 }
 0x67d   :  { %v1228_v38 = vpack.c.bf16 %v2680_v3, %v2679_v60  ;;  %v1167_v5 = vpop.f32.mrb[51].mxu0 }
 0x67e   :  { %v1227_v39 = vpack.c.bf16 %v1167_v5, %v1164_v2 }
 0x680   :  { %2709 = vmatprep.mubr.bf16.mxu1 %v1227_v39 }
 0x681   :  { %2710 = vmatmul.mubr.bf16.vlgmr.msra.gmra.mrb[48].mxu1 %v1228_v38 }
 0x682   :  { %v2683_v6 = vpop.f32.mrb[52].mxu0  ;;  %2758 = vmatpush3.bf16.msra.mxu1 %v2957_v61 }
 0x683   :  { %v1180_v7 = vpop.f32.mrb[53].mxu0  ;;  %2759 = vmatprep.subr.bf16.mxu1 %v2958_v47 }
 0x684   :  { %v2684_v40 = vpop.f32.mrb[54].mxu0 }
 0x685   :  { %v1230_v41 = vpack.c.bf16 %v2684_v40, %v2683_v6  ;;  %v1183_v42 = vpop.f32.mrb[55].mxu0 }
 0x686   :  { %v1229_v43 = vpack.c.bf16 %v1183_v42, %v1180_v7  ;;  %2760 = vmatpush3.bf16.msra.mxu1 %v2958_v47 }
 0x687   :  { %2761 = vmatprep.subr.bf16.mxu1 %v2959_v14 }
 0x688   :  { %2713 = vmatprep.mubr.bf16.mxu1 %v1229_v43 }
 0x689   :  { %2714 = vmatmul.mubr.bf16.gmra.mrb[52].mxu1 %v1230_v41 }
 0x68a   :  { %v2687_v44 = vpop.f32.mrb[56].mxu0  ;;  %2762 = vmatpush3.bf16.msra.mxu1 %v2959_v14  ;;  %v2982_v14 = vld [vmem:[%s3485_s0 + $0x8] sm:$0xff]  }
 0x68b   :  { %v1196_v45 = vpop.f32.mrb[57].mxu0  ;;  %2763 = vmatprep.subr.bf16.mxu1 %v2960_v15 }
 0x68c   :  { %v2688_v46 = vpop.f32.mrb[58].mxu0 }
 0x68d   :  { %v1232_v49 = vpack.c.bf16 %v2688_v46, %v2687_v44  ;;  %v1199_v50 = vpop.f32.mrb[59].mxu0 }
 0x68e   :  { %v1231_v51 = vpack.c.bf16 %v1199_v50, %v1196_v45  ;;  %2764 = vmatpush3.bf16.msra.mxu1 %v2960_v15  ;;  %v2983_v15 = vld [vmem:[%s3485_s0 + $0x10] sm:$0xff]  }
 0x68f   :  { %2765 = vmatprep.subr.bf16.mxu1 %v2961_v62 }
 0x690   :  { %2717 = vmatprep.mubr.bf16.mxu1 %v1231_v51 }
 0x691   :  { %2718 = vmatmul.mubr.bf16.gmra.mrb[56].mxu1 %v1232_v49 }
 0x692   :  { %v2691_v52 = vpop.f32.mrb[60].mxu0  ;;  %2766 = vmatpush3.bf16.msra.mxu1 %v2961_v62  ;;  %v2984_v62 = vld [vmem:[%s3485_s0 + $0x18] sm:$0xff]  }
 0x693   :  { %v1212_v53 = vpop.f32.mrb[61].mxu0  ;;  %2767 = vmatprep.subr.bf16.mxu1 %v2962_v18 }
 0x694   :  { %v2692_v54 = vpop.f32.mrb[62].mxu0 }
 0x695   :  { %v1234_v55 = vpack.c.bf16 %v2692_v54, %v2691_v52  ;;  %v1215_v56 = vpop.f32.mrb[63].mxu0 }
 0x696   :  { %v1233_v58 = vpack.c.bf16 %v1215_v56, %v1212_v53  ;;  %2768 = vmatpush3.bf16.msra.mxu1 %v2962_v18  ;;  %v2985_v18 = vld [vmem:[%s3485_s0 + $0x20] sm:$0xff]  }
 0x697   :  { %2769 = vmatprep.subr.bf16.mxu1 %v2963_v63 }
 0x698   :  { %2721 = vmatprep.mubr.bf16.mxu1 %v1233_v58 }
 0x699   :  { %2722 = vmatmul.mubr.bf16.gmra.mrb[60].mxu1 %v1234_v55 }
 0x69a   :  { %2770 = vmatpush3.bf16.msra.mxu1 %v2963_v63  ;;  %v2986_v63 = vld [vmem:[%s3485_s0 + $0x28] sm:$0xff]  }
 0x754   :  { %v2711_v21 = vpop.f32.mrb[48].mxu1 }
 0x755   :  { %v1330_v0 = vadd.f32 %v2711_v21, %v1238_v20  ;;  %v1321_v22 = vpop.f32.mrb[49].mxu1  ;;  %v2989_v21 = vld [vmem:[%s3487_s1] sm:$0xff]  }
 0x756   :  { %v1322_v8 = vadd.f32 %v1321_v22, %v1238_v20  ;;  %v2712_v48 = vpop.f32.mrb[50].mxu1 }
 0x757   :  { %v1333_v9 = vadd.f32 %v2712_v48, %v1238_v20  ;;  %v1324_v10 = vpop.f32.mrb[51].mxu1  ;;  %v1386_v12 = vmax.f32 %v1330_v0, 0.0  ;;  %v2964_v0 = vld [vmem:[%s3492_s7 + $0x38] sm:$0xff]  }
 0x758   :  { %v1325_v11 = vadd.f32 %v1324_v10, %v1238_v20  ;;  %v1384_v16 = vmax.f32 %v1322_v8, 0.0  ;;  %2771 = vmatprep.subr.bf16.mxu1 %v2964_v0 }
 0x759   :  { %v1387_v13 = vmax.f32 %v1333_v9, 0.0  ;;  %2772 = vmatpush3.bf16.msra.mxu1 %v2964_v0 }
 0x75a   :  { %v1385_v17 = vmax.f32 %v1325_v11, 0.0 }
 0x75b   :  { %v1401_v23 = vpack.c.bf16 %v1387_v13, %v1386_v12 }
 0x75c   :  { %v1400_v24 = vpack.c.bf16 %v1385_v17, %v1384_v16  ;;  %v2715_v25 = vpop.f32.mrb[52].mxu1 }
 0x75d   :  { %v1346_v26 = vadd.f32 %v2715_v25, %v1238_v20  ;;  %v1337_v4 = vpop.f32.mrb[53].mxu1 }
 0x75e   :  { %v1338_v27 = vadd.f32 %v1337_v4, %v1238_v20  ;;  %v2716_v28 = vpop.f32.mrb[54].mxu1  ;;  %2725 = vmatprep.subr.bf16.mxu0 %v1400_v24 }
 0x75f   :  { %v1349_v59 = vadd.f32 %v2716_v28, %v1238_v20  ;;  %v1340_v29 = vpop.f32.mrb[55].mxu1  ;;  %2726 = vmatpush3.bf16.msra.mxu0 %v1400_v24  ;;  %v1390_v31 = vmax.f32 %v1346_v26, 0.0 }
 0x760   :  { %v1341_v30 = vadd.f32 %v1340_v29, %v1238_v20  ;;  %2727 = vmatprep.subr.bf16.mxu0 %v1401_v23  ;;  %v1388_v33 = vmax.f32 %v1338_v27, 0.0 }
 0x761   :  { %v1391_v32 = vmax.f32 %v1349_v59, 0.0 }
 0x762   :  { %v1389_v34 = vmax.f32 %v1341_v30, 0.0 }
 0x763   :  { %v1403_v36 = vpack.c.bf16 %v1391_v32, %v1390_v31  ;;  %2728 = vmatpush3.bf16.msra.mxu0 %v1401_v23 }
 0x764   :  { %v1402_v37 = vpack.c.bf16 %v1389_v34, %v1388_v33  ;;  %v2719_v35 = vpop.f32.mrb[56].mxu1 }
 0x765   :  { %v1362_v1 = vadd.f32 %v2719_v35, %v1238_v20  ;;  %v1353_v60 = vpop.f32.mrb[57].mxu1  ;;  %v2967_v35 = vld [vmem:[%s3493_s8 + $0x10] sm:$0xff]  }
 0x766   :  { %v1354_v2 = vadd.f32 %v1353_v60, %v1238_v20  ;;  %v2720_v3 = vpop.f32.mrb[58].mxu1  ;;  %2729 = vmatprep.subr.bf16.mxu0 %v1402_v37  ;;  %v2969_v60 = vld [vmem:[%s3493_s8 + $0x20] sm:$0xff]  }
 0x767   :  { %v1365_v38 = vadd.f32 %v2720_v3, %v1238_v20  ;;  %v1356_v5 = vpop.f32.mrb[59].mxu1  ;;  %2730 = vmatpush3.bf16.msra.mxu0 %v1402_v37  ;;  %v1394_v6 = vmax.f32 %v1362_v1, 0.0  ;;  %v2966_v37 = vld [vmem:[%s3493_s8 + $0x8] sm:$0xff]   ;;  %v2968_v1 = vld [vmem:[%s3493_s8 + $0x18] sm:$0xff]   ;;  %v2971_v3 = vld [vmem:[%s3493_s8 + $0x30] sm:$0xff]  }
 0x768   :  { %v1357_v39 = vadd.f32 %v1356_v5, %v1238_v20  ;;  %2731 = vmatprep.subr.bf16.mxu0 %v1403_v36  ;;  %v1392_v40 = vmax.f32 %v1354_v2, 0.0  ;;  %v2970_v2 = vld [vmem:[%s3493_s8 + $0x28] sm:$0xff]   ;;  %v3381_v5 = vld [vmem:[%s3489_s10] sm:$0xff] }
 0x769   :  { %v1395_v7 = vmax.f32 %v1365_v38, 0.0  ;;  %v1531_v38 = vsub.s32 4, %v3181_v57 }
 0x76a   :  { %v1393_v41 = vmax.f32 %v1357_v39, 0.0 }
 0x76b   :  { %v1405_v42 = vpack.c.bf16 %v1395_v7, %v1394_v6  ;;  %2732 = vmatpush3.bf16.msra.mxu0 %v1403_v36  ;;  %v2965_v36 = vld [vmem:[%s3493_s8] sm:$0xff]   ;;  %v1532_v39 = vrot.slane %v3381_v5, %v1531_v38  ;;  %v2995_v38 = vld [vmem:[%s3487_s1 + $0x28] sm:$0xff]  }
 0x76c   :  { %v1404_v43 = vpack.c.bf16 %v1393_v41, %v1392_v40  ;;  %v2723_v44 = vpop.f32.mrb[60].mxu1  ;;  %2821 = vmatprep.subr.bf16.mxu1 %v2965_v36 }
 0x76d   :  { %v1378_v45 = vadd.f32 %v2723_v44, %v1238_v20  ;;  %v1369_v46 = vpop.f32.mrb[61].mxu1 }
 0x76e   :  { %v1370_v49 = vadd.f32 %v1369_v46, %v1238_v20  ;;  %v2724_v50 = vpop.f32.mrb[62].mxu1  ;;  %2733 = vmatprep.subr.bf16.mxu0 %v1404_v43 }
 0x76f   :  { %v1381_v51 = vadd.f32 %v2724_v50, %v1238_v20  ;;  %v1372_v52 = vpop.f32.mrb[63].mxu1  ;;  %2734 = vmatpush3.bf16.msra.mxu0 %v1404_v43  ;;  %v1398_v54 = vmax.f32 %v1378_v45, 0.0 }
 0x770   :  { %v1373_v53 = vadd.f32 %v1372_v52, %v1238_v20  ;;  %2735 = vmatprep.subr.bf16.mxu0 %v1405_v42  ;;  %v1396_v56 = vmax.f32 %v1370_v49, 0.0  ;;  %v2988_v20 = vld [vmem:[%s3485_s0 + $0x38] sm:$0xff]  }
 0x771   :  { %v1399_v55 = vmax.f32 %v1381_v51, 0.0 }
 0x772   :  { %v1397_v58 = vmax.f32 %v1373_v53, 0.0 }
 0x773   :  { %v1407_v61 = vpack.c.bf16 %v1399_v55, %v1398_v54  ;;  %2736 = vmatpush3.bf16.msra.mxu0 %v1405_v42 }
 0x774   :  { %v1406_v47 = vpack.c.bf16 %v1397_v58, %v1396_v56 }
 0x776   :  { %2737 = vmatprep.subr.bf16.mxu0 %v1406_v47 }
 0x777   :  { %2738 = vmatpush3.bf16.msra.mxu0 %v1406_v47 }
 0x778   :  { %2739 = vmatprep.subr.bf16.mxu0 %v1407_v61 }
 0x77b   :  { %2740 = vmatpush3.bf16.msra.mxu0 %v1407_v61 }
 0x77e   :  { %2742 = vmatmul.mubr.bf16.vlgmr.msra.gmra.mrb[64].mxu0 %v2982_v14 }
 0x77f   :  { %2745 = vmatprep.mubr.bf16.mxu0 %v2983_v15 }
 0x786   :  { %2746 = vmatmul.mubr.bf16.gmra.mrb[68].mxu0 %v2984_v62 }
 0x787   :  { %2749 = vmatprep.mubr.bf16.mxu0 %v2985_v18 }
 0x78e   :  { %2750 = vmatmul.mubr.bf16.gmra.mrb[72].mxu0 %v2986_v63 }
 0x78f   :  { %2753 = vmatprep.mubr.bf16.mxu0 %v2987_v19 }
 0x796   :  { %2754 = vmatmul.mubr.bf16.gmra.mrb[76].mxu0 %v2988_v20 }
 0x797   :  { %2805 = vmatprep.mubr.bf16.mxu0 %v2989_v21 }
 0x851   :  { %v2743_v22 = vpop.f32.mrb[64].mxu0 }
 0x852   :  { %v1458_v8 = vpop.f32.mrb[65].mxu0 }
 0x853   :  { %v2744_v48 = vpop.f32.mrb[66].mxu0 }
 0x854   :  { %v1522_v9 = vpack.c.bf16 %v2744_v48, %v2743_v22  ;;  %v1461_v10 = vpop.f32.mrb[67].mxu0 }
 0x855   :  { %v1521_v11 = vpack.c.bf16 %v1461_v10, %v1458_v8 }
 0x857   :  { %2773 = vmatprep.mubr.bf16.mxu1 %v1521_v11 }
 0x858   :  { %2774 = vmatmul.mubr.bf16.vlgmr.msra.gmra.mrb[64].mxu1 %v1522_v9 }
 0x859   :  { %v2747_v12 = vpop.f32.mrb[68].mxu0  ;;  %2822 = vmatpush3.bf16.msra.mxu1 %v2965_v36 }
 0x85a   :  { %v1474_v13 = vpop.f32.mrb[69].mxu0  ;;  %2823 = vmatprep.subr.bf16.mxu1 %v2966_v37 }
 0x85b   :  { %v2748_v16 = vpop.f32.mrb[70].mxu0 }
 0x85c   :  { %v1524_v17 = vpack.c.bf16 %v2748_v16, %v2747_v12  ;;  %v1477_v23 = vpop.f32.mrb[71].mxu0 }
 0x85d   :  { %v1523_v24 = vpack.c.bf16 %v1477_v23, %v1474_v13  ;;  %2824 = vmatpush3.bf16.msra.mxu1 %v2966_v37 }
 0x85e   :  { %2825 = vmatprep.subr.bf16.mxu1 %v2967_v35 }
 0x85f   :  { %2777 = vmatprep.mubr.bf16.mxu1 %v1523_v24 }
 0x860   :  { %2778 = vmatmul.mubr.bf16.gmra.mrb[68].mxu1 %v1524_v17 }
 0x861   :  { %v2751_v25 = vpop.f32.mrb[72].mxu0  ;;  %2826 = vmatpush3.bf16.msra.mxu1 %v2967_v35 }
 0x862   :  { %v1490_v26 = vpop.f32.mrb[73].mxu0  ;;  %2827 = vmatprep.subr.bf16.mxu1 %v2968_v1 }
 0x863   :  { %v2752_v4 = vpop.f32.mrb[74].mxu0 }
 0x864   :  { %v1526_v27 = vpack.c.bf16 %v2752_v4, %v2751_v25  ;;  %v1493_v28 = vpop.f32.mrb[75].mxu0 }
 0x865   :  { %v1525_v59 = vpack.c.bf16 %v1493_v28, %v1490_v26  ;;  %2828 = vmatpush3.bf16.msra.mxu1 %v2968_v1  ;;  %v2991_v1 = vld [vmem:[%s3487_s1 + $0x8] sm:$0xff]  }
 0x866   :  { %2829 = vmatprep.subr.bf16.mxu1 %v2969_v60 }
 0x867   :  { %2781 = vmatprep.mubr.bf16.mxu1 %v1525_v59 }
 0x868   :  { %2782 = vmatmul.mubr.bf16.gmra.mrb[72].mxu1 %v1526_v27 }
 0x869   :  { %v2755_v29 = vpop.f32.mrb[76].mxu0  ;;  %2830 = vmatpush3.bf16.msra.mxu1 %v2969_v60  ;;  %v2992_v60 = vld [vmem:[%s3487_s1 + $0x10] sm:$0xff]  }
 0x86a   :  { %v1506_v30 = vpop.f32.mrb[77].mxu0  ;;  %2831 = vmatprep.subr.bf16.mxu1 %v2970_v2 }
 0x86b   :  { %v2756_v31 = vpop.f32.mrb[78].mxu0 }
 0x86c   :  { %v1528_v32 = vpack.c.bf16 %v2756_v31, %v2755_v29  ;;  %v1509_v33 = vpop.f32.mrb[79].mxu0 }
 0x86d   :  { %v1527_v34 = vpack.c.bf16 %v1509_v33, %v1506_v30  ;;  %2832 = vmatpush3.bf16.msra.mxu1 %v2970_v2  ;;  %v2993_v2 = vld [vmem:[%s3487_s1 + $0x18] sm:$0xff]  }
 0x86e   :  { %2833 = vmatprep.subr.bf16.mxu1 %v2971_v3 }
 0x86f   :  { %2785 = vmatprep.mubr.bf16.mxu1 %v1527_v34 }
 0x870   :  { %2786 = vmatmul.mubr.bf16.gmra.mrb[76].mxu1 %v1528_v32 }
 0x871   :  { %2834 = vmatpush3.bf16.msra.mxu1 %v2971_v3  ;;  %v2994_v3 = vld [vmem:[%s3487_s1 + $0x20] sm:$0xff]  }
 0x92b   :  { %v2775_v6 = vpop.f32.mrb[64].mxu1 }
 0x92c   :  { %v1624_v7 = vadd.f32 %v2775_v6, %v1532_v39  ;;  %v1615_v40 = vpop.f32.mrb[65].mxu1  ;;  %v2997_v6 = vld [vmem:[%s3487_s1 + $0x38] sm:$0xff]  }
 0x92d   :  { %v1616_v41 = vadd.f32 %v1615_v40, %v1532_v39  ;;  %v2776_v42 = vpop.f32.mrb[66].mxu1  ;;  %v2973_v40 = vld [vmem:[%s3494_s9] sm:$0xff]  }
 0x92e   :  { %v1627_v43 = vadd.f32 %v2776_v42, %v1532_v39  ;;  %v1618_v44 = vpop.f32.mrb[67].mxu1  ;;  %v1680_v46 = vmax.f32 %v1624_v7, 0.0  ;;  %v2972_v7 = vld [vmem:[%s3493_s8 + $0x38] sm:$0xff]   ;;  %v2975_v42 = vld [vmem:[%s3494_s9 + $0x10] sm:$0xff]  }
 0x92f   :  { %v1619_v45 = vadd.f32 %v1618_v44, %v1532_v39  ;;  %v1678_v50 = vmax.f32 %v1616_v41, 0.0  ;;  %2835 = vmatprep.subr.bf16.mxu1 %v2972_v7  ;;  %v2974_v41 = vld [vmem:[%s3494_s9 + $0x8] sm:$0xff]   ;;  %v2977_v44 = vld [vmem:[%s3494_s9 + $0x20] sm:$0xff]  }
 0x930   :  { %v1681_v49 = vmax.f32 %v1627_v43, 0.0  ;;  %2836 = vmatpush3.bf16.msra.mxu1 %v2972_v7  ;;  %v2976_v43 = vld [vmem:[%s3494_s9 + $0x18] sm:$0xff]  }
 0x931   :  { %v1679_v51 = vmax.f32 %v1619_v45, 0.0  ;;  %2885 = vmatprep.subr.bf16.mxu1 %v2973_v40  ;;  %v2978_v45 = vld [vmem:[%s3494_s9 + $0x28] sm:$0xff]  }
 0x932   :  { %v1695_v52 = vpack.c.bf16 %v1681_v49, %v1680_v46 }
 0x933   :  { %v1694_v53 = vpack.c.bf16 %v1679_v51, %v1678_v50  ;;  %v2779_v54 = vpop.f32.mrb[68].mxu1 }
 0x934   :  { %v1640_v55 = vadd.f32 %v2779_v54, %v1532_v39  ;;  %v1631_v56 = vpop.f32.mrb[69].mxu1 }
 0x935   :  { %v1632_v58 = vadd.f32 %v1631_v56, %v1532_v39  ;;  %v2780_v61 = vpop.f32.mrb[70].mxu1  ;;  %2789 = vmatprep.subr.bf16.mxu0 %v1694_v53 }
 0x936   :  { %v1643_v47 = vadd.f32 %v2780_v61, %v1532_v39  ;;  %v1634_v14 = vpop.f32.mrb[71].mxu1  ;;  %2790 = vmatpush3.bf16.msra.mxu0 %v1694_v53  ;;  %v1684_v62 = vmax.f32 %v1640_v55, 0.0 }
 0x937   :  { %v1635_v15 = vadd.f32 %v1634_v14, %v1532_v39  ;;  %2791 = vmatprep.subr.bf16.mxu0 %v1695_v52  ;;  %v1682_v63 = vmax.f32 %v1632_v58, 0.0 }
 0x938   :  { %v1685_v18 = vmax.f32 %v1643_v47, 0.0 }
 0x939   :  { %v1683_v19 = vmax.f32 %v1635_v15, 0.0 }
 0x93a   :  { %v1697_v20 = vpack.c.bf16 %v1685_v18, %v1684_v62  ;;  %2792 = vmatpush3.bf16.msra.mxu0 %v1695_v52 }
 0x93b   :  { %v1696_v21 = vpack.c.bf16 %v1683_v19, %v1682_v63  ;;  %v2783_v0 = vpop.f32.mrb[72].mxu1 }
 0x93c   :  { %v1656_v22 = vadd.f32 %v2783_v0, %v1532_v39  ;;  %v1647_v8 = vpop.f32.mrb[73].mxu1 }
 0x93d   :  { %v1648_v48 = vadd.f32 %v1647_v8, %v1532_v39  ;;  %v2784_v9 = vpop.f32.mrb[74].mxu1  ;;  %2793 = vmatprep.subr.bf16.mxu0 %v1696_v21 }
 0x93e   :  { %v1659_v10 = vadd.f32 %v2784_v9, %v1532_v39  ;;  %v1650_v11 = vpop.f32.mrb[75].mxu1  ;;  %2794 = vmatpush3.bf16.msra.mxu0 %v1696_v21  ;;  %v1688_v13 = vmax.f32 %v1656_v22, 0.0  ;;  %v2979_v9 = vld [vmem:[%s3494_s9 + $0x30] sm:$0xff]  }
 0x93f   :  { %v1651_v12 = vadd.f32 %v1650_v11, %v1532_v39  ;;  %2795 = vmatprep.subr.bf16.mxu0 %v1697_v20  ;;  %v1686_v17 = vmax.f32 %v1648_v48, 0.0  ;;  %v1825_v11 = vsub.s32 5, %v3181_v57 }
 0x940   :  { %v1689_v16 = vmax.f32 %v1659_v10, 0.0  ;;  %v2980_v10 = vld [vmem:[%s3494_s9 + $0x38] sm:$0xff]  }
 0x941   :  { %v1687_v23 = vmax.f32 %v1651_v12, 0.0  ;;  %v1826_v12 = vrot.slane %v3381_v5, %v1825_v11 }
 0x942   :  { %v1699_v24 = vpack.c.bf16 %v1689_v16, %v1688_v13  ;;  %2796 = vmatpush3.bf16.msra.mxu0 %v1697_v20 }
 0x943   :  { %v1698_v25 = vpack.c.bf16 %v1687_v23, %v1686_v17  ;;  %v2787_v26 = vpop.f32.mrb[76].mxu1 }
 0x944   :  { %v1672_v4 = vadd.f32 %v2787_v26, %v1532_v39  ;;  %v1663_v27 = vpop.f32.mrb[77].mxu1 }
 0x945   :  { %v1664_v28 = vadd.f32 %v1663_v27, %v1532_v39  ;;  %v2788_v59 = vpop.f32.mrb[78].mxu1  ;;  %2797 = vmatprep.subr.bf16.mxu0 %v1698_v25 }
 0x946   :  { %v1675_v29 = vadd.f32 %v2788_v59, %v1532_v39  ;;  %v1666_v30 = vpop.f32.mrb[79].mxu1  ;;  %2798 = vmatpush3.bf16.msra.mxu0 %v1698_v25  ;;  %v1692_v32 = vmax.f32 %v1672_v4, 0.0 }
 0x947   :  { %v1667_v31 = vadd.f32 %v1666_v30, %v1532_v39  ;;  %2799 = vmatprep.subr.bf16.mxu0 %v1699_v24  ;;  %v1690_v34 = vmax.f32 %v1664_v28, 0.0  ;;  %v2996_v39 = vld [vmem:[%s3487_s1 + $0x30] sm:$0xff]  }
 0x948   :  { %v1693_v33 = vmax.f32 %v1675_v29, 0.0 }
 0x949   :  { %v1691_v36 = vmax.f32 %v1667_v31, 0.0 }
 0x94a   :  { %v1701_v37 = vpack.c.bf16 %v1693_v33, %v1692_v32  ;;  %2800 = vmatpush3.bf16.msra.mxu0 %v1699_v24 }
 0x94b   :  { %v1700_v35 = vpack.c.bf16 %v1691_v36, %v1690_v34 }
 0x94d   :  { %2801 = vmatprep.subr.bf16.mxu0 %v1700_v35 }
 0x94e   :  { %2802 = vmatpush3.bf16.msra.mxu0 %v1700_v35 }
 0x94f   :  { %2803 = vmatprep.subr.bf16.mxu0 %v1701_v37 }
 0x952   :  { %2804 = vmatpush3.bf16.msra.mxu0 %v1701_v37 }
 0x953   :  { %2853 = vmatprep.subr.bf16.mxu0 %v2973_v40 }
 0x955   :  { %2806 = vmatmul.mubr.bf16.vlgmr.msra.gmra.mrb[80].mxu0 %v2991_v1 }
 0x956   :  { %2809 = vmatprep.mubr.bf16.mxu0 %v2992_v60  ;;  %2854 = vmatpush3.bf16.msra.mxu0 %v2973_v40 }
 0x957   :  { %2855 = vmatprep.subr.bf16.mxu0 %v2974_v41 }
 0x95a   :  { %2856 = vmatpush3.bf16.msra.mxu0 %v2974_v41 }
 0x95b   :  { %2857 = vmatprep.subr.bf16.mxu0 %v2975_v42 }
 0x95d   :  { %2810 = vmatmul.mubr.bf16.gmra.mrb[84].mxu0 %v2993_v2 }
 0x95e   :  { %2813 = vmatprep.mubr.bf16.mxu0 %v2994_v3  ;;  %2858 = vmatpush3.bf16.msra.mxu0 %v2975_v42 }
 0x95f   :  { %2859 = vmatprep.subr.bf16.mxu0 %v2976_v43 }
 0x962   :  { %2860 = vmatpush3.bf16.msra.mxu0 %v2976_v43 }
 0x963   :  { %2861 = vmatprep.subr.bf16.mxu0 %v2977_v44 }
 0x965   :  { %2814 = vmatmul.mubr.bf16.gmra.mrb[88].mxu0 %v2995_v38 }
 0x966   :  { %2817 = vmatprep.mubr.bf16.mxu0 %v2996_v39  ;;  %2862 = vmatpush3.bf16.msra.mxu0 %v2977_v44 }
 0x967   :  { %2863 = vmatprep.subr.bf16.mxu0 %v2978_v45 }
 0x96a   :  { %2864 = vmatpush3.bf16.msra.mxu0 %v2978_v45 }
 0x96b   :  { %2865 = vmatprep.subr.bf16.mxu0 %v2979_v9 }
 0x96d   :  { %2818 = vmatmul.mubr.bf16.gmra.mrb[92].mxu0 %v2997_v6 }
 0x96e   :  { %2866 = vmatpush3.bf16.msra.mxu0 %v2979_v9 }
 0x96f   :  { %2867 = vmatprep.subr.bf16.mxu0 %v2980_v10 }
 0x972   :  { %2868 = vmatpush3.bf16.msra.mxu0 %v2980_v10 }
 0xa28   :  { %v2807_v46 = vpop.f32.mrb[80].mxu0 }
 0xa29   :  { %v1752_v49 = vpop.f32.mrb[81].mxu0 }
 0xa2a   :  { %v2808_v50 = vpop.f32.mrb[82].mxu0 }
 0xa2b   :  { %v1816_v51 = vpack.c.bf16 %v2808_v50, %v2807_v46  ;;  %v1755_v52 = vpop.f32.mrb[83].mxu0 }
 0xa2c   :  { %v1815_v53 = vpack.c.bf16 %v1755_v52, %v1752_v49 }
 0xa2e   :  { %2837 = vmatprep.mubr.bf16.mxu1 %v1815_v53 }
 0xa2f   :  { %2838 = vmatmul.mubr.bf16.vlgmr.msra.gmra.mrb[80].mxu1 %v1816_v51 }
 0xa30   :  { %v2811_v54 = vpop.f32.mrb[84].mxu0  ;;  %2893 = vmatpush3.bf16.msra.mxu1 %v2973_v40 }
 0xa31   :  { %v1768_v55 = vpop.f32.mrb[85].mxu0  ;;  %2886 = vmatprep.subr.bf16.mxu1 %v2974_v41 }
 0xa32   :  { %v2812_v56 = vpop.f32.mrb[86].mxu0 }
 0xa33   :  { %v1818_v58 = vpack.c.bf16 %v2812_v56, %v2811_v54  ;;  %v1771_v61 = vpop.f32.mrb[87].mxu0 }
 0xa34   :  { %v1817_v47 = vpack.c.bf16 %v1771_v61, %v1768_v55  ;;  %2894 = vmatpush3.bf16.msra.mxu1 %v2974_v41 }
 0xa35   :  { %2887 = vmatprep.subr.bf16.mxu1 %v2975_v42 }
 0xa36   :  { %2841 = vmatprep.mubr.bf16.mxu1 %v1817_v47 }
 0xa37   :  { %2842 = vmatmul.mubr.bf16.gmra.mrb[84].mxu1 %v1818_v58 }
 0xa38   :  { %v2815_v14 = vpop.f32.mrb[88].mxu0  ;;  %2895 = vmatpush3.bf16.msra.mxu1 %v2975_v42 }
 0xa39   :  { %v1784_v15 = vpop.f32.mrb[89].mxu0  ;;  %2888 = vmatprep.subr.bf16.mxu1 %v2976_v43 }
 0xa3a   :  { %v2816_v62 = vpop.f32.mrb[90].mxu0 }
 0xa3b   :  { %v1820_v18 = vpack.c.bf16 %v2816_v62, %v2815_v14  ;;  %v1787_v63 = vpop.f32.mrb[91].mxu0 }
 0xa3c   :  { %v1819_v19 = vpack.c.bf16 %v1787_v63, %v1784_v15  ;;  %2896 = vmatpush3.bf16.msra.mxu1 %v2976_v43 }
 0xa3d   :  { %2889 = vmatprep.subr.bf16.mxu1 %v2977_v44 }
 0xa3e   :  { %2845 = vmatprep.mubr.bf16.mxu1 %v1819_v19 }
 0xa3f   :  { %2846 = vmatmul.mubr.bf16.gmra.mrb[88].mxu1 %v1820_v18 }
 0xa40   :  { %v2819_v20 = vpop.f32.mrb[92].mxu0  ;;  %2897 = vmatpush3.bf16.msra.mxu1 %v2977_v44 }
 0xa41   :  { %v1800_v21 = vpop.f32.mrb[93].mxu0  ;;  %2890 = vmatprep.subr.bf16.mxu1 %v2978_v45 }
 0xa42   :  { %v2820_v0 = vpop.f32.mrb[94].mxu0 }
 0xa43   :  { %v1822_v22 = vpack.c.bf16 %v2820_v0, %v2819_v20  ;;  %v1803_v8 = vpop.f32.mrb[95].mxu0 }
 0xa44   :  { %v1821_v48 = vpack.c.bf16 %v1803_v8, %v1800_v21  ;;  %2898 = vmatpush3.bf16.msra.mxu1 %v2978_v45  ;;  %v2014_v8 = vsub.s32 6, %v3181_v57 }
 0xa45   :  { %2891 = vmatprep.subr.bf16.mxu1 %v2979_v9 }
 0xa46   :  { %2849 = vmatprep.mubr.bf16.mxu1 %v1821_v48  ;;  %v2015_v48 = vrot.slane %v3381_v5, %v2014_v8 }
 0xa47   :  { %2850 = vmatmul.mubr.bf16.gmra.mrb[92].mxu1 %v1822_v22 }
 0xa48   :  { %2899 = vmatpush3.bf16.msra.mxu1 %v2979_v9 }
 0xa49   :  { %2892 = vmatprep.subr.bf16.mxu1 %v2980_v10 }
 0xa4c   :  { %2900 = vmatpush3.bf16.msra.mxu1 %v2980_v10 }
 0xb02   :  { %v2839_v13 = vpop.f32.mrb[80].mxu1 }
 0xb03   :  { %v1918_v16 = vadd.f32 %v2839_v13, %v1826_v12  ;;  %v1909_v17 = vpop.f32.mrb[81].mxu1 }
 0xb04   :  { %v1910_v23 = vadd.f32 %v1909_v17, %v1826_v12  ;;  %v2840_v24 = vpop.f32.mrb[82].mxu1 }
 0xb05   :  { %v1921_v25 = vadd.f32 %v2840_v24, %v1826_v12  ;;  %v1912_v26 = vpop.f32.mrb[83].mxu1  ;;  %v1974_v27 = vmax.f32 %v1918_v16, 0.0 }
 0xb06   :  { %v1913_v4 = vadd.f32 %v1912_v26, %v1826_v12  ;;  %v1972_v59 = vmax.f32 %v1910_v23, 0.0 }
 0xb07   :  { %v1975_v28 = vmax.f32 %v1921_v25, 0.0 }
 0xb08   :  { %v1973_v29 = vmax.f32 %v1913_v4, 0.0 }
 0xb09   :  { %v1989_v30 = vpack.c.bf16 %v1975_v28, %v1974_v27 }
 0xb0a   :  { %v1988_v31 = vpack.c.bf16 %v1973_v29, %v1972_v59  ;;  %v2843_v32 = vpop.f32.mrb[84].mxu1 }
 0xb0b   :  { %v1934_v33 = vadd.f32 %v2843_v32, %v1826_v12  ;;  %v1925_v34 = vpop.f32.mrb[85].mxu1 }
 0xb0c   :  { %v1926_v36 = vadd.f32 %v1925_v34, %v1826_v12  ;;  %v2844_v37 = vpop.f32.mrb[86].mxu1  ;;  %2869 = vmatprep.mubr.bf16.mxu0 %v1988_v31 }
 0xb0d   :  { %v1937_v35 = vadd.f32 %v2844_v37, %v1826_v12  ;;  %v1928_v1 = vpop.f32.mrb[87].mxu1  ;;  %2870 = vmatmul.mubr.bf16.vlgmr.msra.gmra.mrb[96].mxu0 %v1989_v30  ;;  %v1978_v2 = vmax.f32 %v1934_v33, 0.0 }
 0xb0e   :  { %v1929_v60 = vadd.f32 %v1928_v1, %v1826_v12  ;;  %v1976_v38 = vmax.f32 %v1926_v36, 0.0 }
 0xb0f   :  { %v1979_v3 = vmax.f32 %v1937_v35, 0.0 }
 0xb10   :  { %v1977_v39 = vmax.f32 %v1929_v60, 0.0 }
 0xb11   :  { %v1991_v6 = vpack.c.bf16 %v1979_v3, %v1978_v2 }
 0xb12   :  { %v1990_v7 = vpack.c.bf16 %v1977_v39, %v1976_v38  ;;  %v2847_v40 = vpop.f32.mrb[88].mxu1 }
 0xb13   :  { %v1950_v41 = vadd.f32 %v2847_v40, %v1826_v12  ;;  %v1941_v42 = vpop.f32.mrb[89].mxu1 }
 0xb14   :  { %v1942_v43 = vadd.f32 %v1941_v42, %v1826_v12  ;;  %v2848_v44 = vpop.f32.mrb[90].mxu1  ;;  %2873 = vmatprep.mubr.bf16.mxu0 %v1990_v7 }
 0xb15   :  { %v1953_v45 = vadd.f32 %v2848_v44, %v1826_v12  ;;  %v1944_v46 = vpop.f32.mrb[91].mxu1  ;;  %2874 = vmatmul.mubr.bf16.gmra.mrb[100].mxu0 %v1991_v6  ;;  %v1982_v50 = vmax.f32 %v1950_v41, 0.0 }
 0xb16   :  { %v1945_v49 = vadd.f32 %v1944_v46, %v1826_v12  ;;  %v1980_v52 = vmax.f32 %v1942_v43, 0.0 }
 0xb17   :  { %v1983_v51 = vmax.f32 %v1953_v45, 0.0 }
 0xb18   :  { %v1981_v53 = vmax.f32 %v1945_v49, 0.0 }
 0xb19   :  { %v1993_v54 = vpack.c.bf16 %v1983_v51, %v1982_v50 }
 0xb1a   :  { %v1992_v55 = vpack.c.bf16 %v1981_v53, %v1980_v52  ;;  %v2851_v56 = vpop.f32.mrb[92].mxu1 }
 0xb1b   :  { %v1966_v58 = vadd.f32 %v2851_v56, %v1826_v12  ;;  %v1957_v61 = vpop.f32.mrb[93].mxu1 }
 0xb1c   :  { %v1958_v47 = vadd.f32 %v1957_v61, %v1826_v12  ;;  %v2852_v14 = vpop.f32.mrb[94].mxu1  ;;  %2877 = vmatprep.mubr.bf16.mxu1 %v1992_v55 }
 0xb1d   :  { %v1969_v15 = vadd.f32 %v2852_v14, %v1826_v12  ;;  %v1960_v62 = vpop.f32.mrb[95].mxu1  ;;  %2878 = vmatmul.mubr.bf16.vlgmr.msra.gmra.mrb[96].mxu1 %v1993_v54  ;;  %v1986_v63 = vmax.f32 %v1966_v58, 0.0 }
 0xb1e   :  { %v1961_v18 = vadd.f32 %v1960_v62, %v1826_v12  ;;  %v1984_v20 = vmax.f32 %v1958_v47, 0.0 }
 0xb1f   :  { %v1987_v19 = vmax.f32 %v1969_v15, 0.0 }
 0xb20   :  { %v1985_v21 = vmax.f32 %v1961_v18, 0.0 }
 0xb21   :  { %v1995_v0 = vpack.c.bf16 %v1987_v19, %v1986_v63 }
 0xb22   :  { %v1994_v22 = vpack.c.bf16 %v1985_v21, %v1984_v20 }
 0xb24   :  { %2881 = vmatprep.mubr.bf16.mxu1 %v1994_v22 }
 0xb25   :  { %2882 = vmatmul.mubr.bf16.gmra.mrb[100].mxu1 %v1995_v0 }
 0xbe0   :  { %v2871_v9 = vpop.f32.mrb[96].mxu0 }
 0xbe1   :  { %v2107_v10 = vadd.f32 %v2871_v9, %v2015_v48  ;;  %v2098_v11 = vpop.f32.mrb[97].mxu0 }
 0xbe2   :  { %v2099_v13 = vadd.f32 %v2098_v11, %v2015_v48  ;;  %v2872_v16 = vpop.f32.mrb[98].mxu0 }
 0xbe3   :  { %2163 = vst [vmem:[%s3495_s11 + $0x10] sm:$0xff] %v2107_v10  ;;  %v2110_v12 = vadd.f32 %v2872_v16, %v2015_v48  ;;  %v2101_v17 = vpop.f32.mrb[99].mxu0 }
 0xbe4   :  { %2161 = vst [vmem:[%s3495_s11] sm:$0xff] %v2099_v13  ;;  %v2102_v23 = vadd.f32 %v2101_v17, %v2015_v48 }
 0xbe5   :  { %2164 = vst [vmem:[%s3495_s11 + $0x18] sm:$0xff] %v2110_v12 }
 0xbe6   :  { %2162 = vst [vmem:[%s3495_s11 + $0x8] sm:$0xff] %v2102_v23 }
 0xbe8   :  { %v2875_v57 = vpop.f32.mrb[100].mxu0 }
 0xbe9   :  { %v2123_v5 = vadd.f32 %v2875_v57, %v2015_v48  ;;  %v2114_v24 = vpop.f32.mrb[101].mxu0 }
 0xbea   :  { %v2115_v25 = vadd.f32 %v2114_v24, %v2015_v48  ;;  %v2876_v26 = vpop.f32.mrb[102].mxu0 }
 0xbeb   :  { %2167 = vst [vmem:[%s3495_s11 + $0x30] sm:$0xff] %v2123_v5  ;;  %v2126_v4 = vadd.f32 %v2876_v26, %v2015_v48  ;;  %v2117_v27 = vpop.f32.mrb[103].mxu0 }
 0xbec   :  { %2165 = vst [vmem:[%s3495_s11 + $0x20] sm:$0xff] %v2115_v25  ;;  %v2118_v28 = vadd.f32 %v2117_v27, %v2015_v48 }
 0xbed   :  { %2168 = vst [vmem:[%s3495_s11 + $0x38] sm:$0xff] %v2126_v4 }
 0xbee   :  { %2166 = vst [vmem:[%s3495_s11 + $0x28] sm:$0xff] %v2118_v28 }
 0xbf0   :  { %v2879_v59 = vpop.f32.mrb[96].mxu1 }
 0xbf1   :  { %v2139_v29 = vadd.f32 %v2879_v59, %v2015_v48  ;;  %v2130_v30 = vpop.f32.mrb[97].mxu1 }
 0xbf2   :  { %v2131_v31 = vadd.f32 %v2130_v30, %v2015_v48  ;;  %v2880_v32 = vpop.f32.mrb[98].mxu1 }
 0xbf3   :  { %2171 = vst [vmem:[%s3495_s11 + $0x50] sm:$0xff] %v2139_v29  ;;  %v2142_v33 = vadd.f32 %v2880_v32, %v2015_v48  ;;  %v2133_v34 = vpop.f32.mrb[99].mxu1 }
 0xbf4   :  { %2169 = vst [vmem:[%s3495_s11 + $0x40] sm:$0xff] %v2131_v31  ;;  %v2134_v36 = vadd.f32 %v2133_v34, %v2015_v48 }
 0xbf5   :  { %2172 = vst [vmem:[%s3495_s11 + $0x58] sm:$0xff] %v2142_v33 }
 0xbf6   :  { %2170 = vst [vmem:[%s3495_s11 + $0x48] sm:$0xff] %v2134_v36 }
 0xbf8   :  { %v2883_v37 = vpop.f32.mrb[100].mxu1 }
 0xbf9   :  { %v2155_v35 = vadd.f32 %v2883_v37, %v2015_v48  ;;  %v2146_v1 = vpop.f32.mrb[101].mxu1 }
 0xbfa   :  { %v2147_v60 = vadd.f32 %v2146_v1, %v2015_v48  ;;  %v2884_v2 = vpop.f32.mrb[102].mxu1 }
 0xbfb   :  { %2175 = vst [vmem:[%s3495_s11 + $0x70] sm:$0xff] %v2155_v35  ;;  %v2158_v3 = vadd.f32 %v2884_v2, %v2015_v48  ;;  %v2149_v38 = vpop.f32.mrb[103].mxu1 }
 0xbfc   :  { %2173 = vst [vmem:[%s3495_s11 + $0x60] sm:$0xff] %v2147_v60  ;;  %v2150_v39 = vadd.f32 %v2149_v38, %v2015_v48 }
 0xbfd   :  { %2176 = vst [vmem:[%s3495_s11 + $0x78] sm:$0xff] %v2158_v3 }
 0xbfe   :  { %2174 = vst [vmem:[%s3495_s11 + $0x68] sm:$0xff] %v2150_v39 }

</bundles_post_ra>
